<compile_context>
chip_gen: v5e
topology: v5e:2x2
jax: 0.10.0
libtpu: 0.0.40
codegen_flags: <defaults>
</compile_context>

<pallas_src>
import functools

import jax
import jax.numpy as jnp
from jax.experimental import pallas as pl
from jax.experimental.pallas import tpu as pltpu


# ----------------------------------------------------------------------------
# Fused BiLSTM + hidden2tag kernel (single invocation, everything in VMEM)
# ----------------------------------------------------------------------------
def _bilstm_kernel(x_ref,            # [T*B, E]   time-major flattened embeddings
                   wih_ref,          # [E, 8H]    (Wih_f^T ++ Wih_b^T) on lane axis
                   whh_f_ref,        # [H, 4H]    Whh_f^T
                   whh_b_ref,        # [H, 4H]    Whh_b^T
                   b_ref,            # [1, 8H]    (b_f ++ b_b), each = b_ih + b_hh
                   wtag_f_ref,       # [H, tag]   w_tag[:, :H]^T
                   wtag_b_ref,       # [H, tag]   w_tag[:, H:]^T
                   btag_ref,         # [1, tag]
                   logits_ref,       # [T*B, tag] output
                   zx_f_s, zx_b_s,   # VMEM (T*B, 4H) scratch
                   hs_f, hs_b,       # VMEM (T*B, H)  scratch
                   *, T, B, H):
    # --- hoisted input projection: one big MXU matmul for all T, both directions
    zx = jnp.dot(x_ref[...], wih_ref[...],
                 preferred_element_type=jnp.float32) + b_ref[...]     # [T*B, 8H]
    zx_f_s[...] = zx[:, :4 * H]          # lane slice at a 128-aligned boundary
    zx_b_s[...] = zx[:, 4 * H:]

    whh_f = whh_f_ref[...]
    whh_b = whh_b_ref[...]

    def cell(z_x, h, c, whh):
        # z_x already contains x@Wih^T + (b_ih + b_hh)
        z = z_x + jnp.dot(h, whh, preferred_element_type=jnp.float32)  # [B, 4H]
        # full-tile transcendentals (EUP), slice gates afterwards
        sig = jax.nn.sigmoid(z)
        th = jnp.tanh(z)
        i = sig[:, 0 * H:1 * H]
        f = sig[:, 1 * H:2 * H]
        g = th[:, 2 * H:3 * H]
        o = sig[:, 3 * H:4 * H]
        c_new = f * c + i * g
        h_new = o * jnp.tanh(c_new)
        return h_new, c_new

    zeros = jnp.zeros((B, H), jnp.float32)

    # --- forward direction over t = 0 .. T-1
    def fwd_body(t, carry):
        h, c = carry
        row = pl.multiple_of(t * B, B)
        h, c = cell(zx_f_s[pl.ds(row, B), :], h, c, whh_f)
        hs_f[pl.ds(row, B), :] = h
        return h, c

    jax.lax.fori_loop(0, T, fwd_body, (zeros, zeros), unroll=True)

    # --- backward direction over t = T-1 .. 0
    def bwd_body(t, carry):
        h, c = carry
        row = pl.multiple_of((T - 1 - t) * B, B)
        h, c = cell(zx_b_s[pl.ds(row, B), :], h, c, whh_b)
        hs_b[pl.ds(row, B), :] = h
        return h, c

    jax.lax.fori_loop(0, T, bwd_body, (zeros, zeros), unroll=True)

    # --- fused hidden2tag epilogue (no concat, no big transpose)
    logits_ref[...] = (
        jnp.dot(hs_f[...], wtag_f_ref[...], preferred_element_type=jnp.float32)
        + jnp.dot(hs_b[...], wtag_b_ref[...], preferred_element_type=jnp.float32)
        + btag_ref[...])


# ----------------------------------------------------------------------------
# Wrapper
# ----------------------------------------------------------------------------
def prepare_params(raw):
    """One-time weight preparation: pre-transpose / fuse so the kernel never transposes."""
    H = raw["whh_f"].shape[1]
    return {
        "embedding": raw["embedding"],
        "wih_all":  jnp.concatenate([raw["wih_f"].T, raw["wih_b"].T], axis=1),  # [E, 8H]
        "whh_f_t":  raw["whh_f"].T,                                             # [H, 4H]
        "whh_b_t":  raw["whh_b"].T,                                             # [H, 4H]
        "b_all":    jnp.concatenate([raw["b_f"], raw["b_b"]], axis=1),          # [1, 8H]
        "wtag_f_t": raw["w_tag"][:, :H].T,                                      # [H, tag]
        "wtag_b_t": raw["w_tag"][:, H:].T,                                      # [H, tag]
        "b_tag":    raw["b_tag"],                                               # [1, tag]
    }


def bilstm_model(x_ids, p):
    """x_ids: [B, T] int32 -> logits [B, T, tag_size]."""
    B, T = x_ids.shape
    E = p["embedding"].shape[1]
    H = p["whh_f_t"].shape[0]
    tag = p["b_tag"].shape[1]

    # embedding gather + time-major flatten (plain-JAX glue)
    embeds = jnp.take(p["embedding"], x_ids, axis=0)                 # [B, T, E]
    x_flat = jnp.transpose(embeds, (1, 0, 2)).reshape(T * B, E)      # [T*B, E]

    full = lambda shape: pl.BlockSpec(shape, lambda: tuple(0 for _ in shape))

    logits_flat = pl.pallas_call(
        functools.partial(_bilstm_kernel, T=T, B=B, H=H),
        in_specs=[
            full((T * B, E)),
            full((E, 8 * H)),
            full((H, 4 * H)),
            full((H, 4 * H)),
            full((1, 8 * H)),
            full((H, tag)),
            full((H, tag)),
            full((1, tag)),
        ],
        out_specs=full((T * B, tag)),
        out_shape=jax.ShapeDtypeStruct((T * B, tag), jnp.float32),
        scratch_shapes=[
            pltpu.VMEM((T * B, 4 * H), jnp.float32),   # zx forward
            pltpu.VMEM((T * B, 4 * H), jnp.float32),   # zx backward
            pltpu.VMEM((T * B, H), jnp.float32),       # h sequence forward
            pltpu.VMEM((T * B, H), jnp.float32),       # h sequence backward
        ],
    )(x_flat, p["wih_all"], p["whh_f_t"], p["whh_b_t"], p["b_all"],
      p["wtag_f_t"], p["wtag_b_t"], p["b_tag"])

    # only the tiny logits tensor gets reshaped/transposed back to batch-first
    return jnp.transpose(logits_flat.reshape(T, B, tag), (1, 0, 2))


# ----------------------------------------------------------------------------
# Pure-JAX reference (PyTorch LSTM semantics) for the correctness check
# ----------------------------------------------------------------------------
def _ref_direction(x_tm, wih, whh, b, H):
    def step(carry, x_t):
        h, c = carry
        z = x_t @ wih.T + h @ whh.T + b[0]
        i = jax.nn.sigmoid(z[:, :H])
        f = jax.nn.sigmoid(z[:, H:2 * H])
        g = jnp.tanh(z[:, 2 * H:3 * H])
        o = jax.nn.sigmoid(z[:, 3 * H:])
        c = f * c + i * g
        h = o * jnp.tanh(c)
        return (h, c), h

    B = x_tm.shape[1]
    init = (jnp.zeros((B, H)), jnp.zeros((B, H)))
    _, hs = jax.lax.scan(step, init, x_tm)
    return hs  # [T, B, H]


def bilstm_model_ref(x_ids, raw):
    embeds = jnp.take(raw["embedding"], x_ids, axis=0)
    x_tm = jnp.transpose(embeds, (1, 0, 2))
    H = raw["whh_f"].shape[1]
    hf = _ref_direction(x_tm, raw["wih_f"], raw["whh_f"], raw["b_f"], H)
    hb = _ref_direction(x_tm[::-1], raw["wih_b"], raw["whh_b"], raw["b_b"], H)[::-1]
    h = jnp.concatenate([hf, hb], axis=-1)
    h = jnp.transpose(h, (1, 0, 2))
    return h @ raw["w_tag"].T + raw["b_tag"][0]


# ----------------------------------------------------------------------------
def init_params(key, vocab, embed_dim, hidden_dim, tag_size):
    H = hidden_dim // 2
    ks = jax.random.split(key, 12)
    u = lambda k, shape, s: jax.random.uniform(k, shape, jnp.float32, -s, s)
    scale = 1.0 / jnp.sqrt(H)
    return {
        "embedding": jax.random.normal(ks[0], (vocab, embed_dim), jnp.float32),
        "wih_f": u(ks[1], (4 * H, embed_dim), scale),
        "whh_f": u(ks[2], (4 * H, H), scale),
        "b_f":   u(ks[3], (1, 4 * H), scale),      # b_ih + b_hh fused
        "wih_b": u(ks[4], (4 * H, embed_dim), scale),
        "whh_b": u(ks[5], (4 * H, H), scale),
        "b_b":   u(ks[6], (1, 4 * H), scale),
        "w_tag": u(ks[7], (tag_size, hidden_dim), 1.0 / jnp.sqrt(hidden_dim)),
        "b_tag": u(ks[8], (1, tag_size), 1.0 / jnp.sqrt(hidden_dim)),
    }


if __name__ == "__main__":
    vocab, embed_dim, hidden_dim, tag_size = 50, 32, 64, 8
    B, T = 8, 10

    key = jax.random.PRNGKey(0)
    kp, kx = jax.random.split(key)
    raw_params = init_params(kp, vocab, embed_dim, hidden_dim, tag_size)
    params = prepare_params(raw_params)
    x_ids = jax.random.randint(kx, (B, T), 0, vocab, dtype=jnp.int32)

    out = jax.block_until_ready(jax.jit(bilstm_model)(x_ids, params))
    ref = jax.block_until_ready(jax.jit(bilstm_model_ref)(x_ids, raw_params))

    assert out.shape == (B, T, tag_size), out.shape
    assert jnp.allclose(out, ref, atol=1e-4, rtol=1e-4), "mismatch vs reference"
    print("KERNEL_OK")
</pallas_src>

<mosaic_0001>
module attributes {stable_mosaic.version = 11 : i64} {
  func.func @_bilstm_kernel(%arg0: memref<80x32xf32, #tpu.memory_space<vmem>>, %arg1: memref<32x256xf32, #tpu.memory_space<vmem>>, %arg2: memref<32x128xf32, #tpu.memory_space<vmem>>, %arg3: memref<32x128xf32, #tpu.memory_space<vmem>>, %arg4: memref<1x256xf32, #tpu.memory_space<vmem>>, %arg5: memref<32x8xf32, #tpu.memory_space<vmem>>, %arg6: memref<32x8xf32, #tpu.memory_space<vmem>>, %arg7: memref<1x8xf32, #tpu.memory_space<vmem>>, %arg8: memref<80x8xf32, #tpu.memory_space<vmem>>, %arg9: memref<80x128xf32, #tpu.memory_space<vmem>>, %arg10: memref<80x128xf32, #tpu.memory_space<vmem>>, %arg11: memref<80x32xf32, #tpu.memory_space<vmem>>, %arg12: memref<80x32xf32, #tpu.memory_space<vmem>>) attributes {dimension_semantics = [], scalar_prefetch = 0 : i64, scratch_operands = 4 : i64, tpu.core_type = #tpu.core_type<tc>} {
    %c0 = arith.constant 0 : index
    %c0_0 = arith.constant 0 : index
    %0 = vector.load %arg0[%c0, %c0_0] : memref<80x32xf32, #tpu.memory_space<vmem>>, vector<80x32xf32>
    %c0_1 = arith.constant 0 : index
    %c0_2 = arith.constant 0 : index
    %1 = vector.load %arg1[%c0_1, %c0_2] : memref<32x256xf32, #tpu.memory_space<vmem>>, vector<32x256xf32>
    %cst = arith.constant dense<0.000000e+00> : vector<80x256xf32>
    %2 = tpu.matmul %0, %1, %cst {dimension_numbers = #tpu.dot_dimension_numbers<[1], [0], [0], [1], [0, 0, 1, 1], [], []>} : vector<80x32xf32>, vector<32x256xf32>, vector<80x256xf32> -> vector<80x256xf32>
    %c0_3 = arith.constant 0 : index
    %c0_4 = arith.constant 0 : index
    %3 = vector.load %arg4[%c0_3, %c0_4] : memref<1x256xf32, #tpu.memory_space<vmem>>, vector<1x256xf32>
    %4 = vector.broadcast %3 : vector<1x256xf32> to vector<80x256xf32>
    %5 = arith.addf %2, %4 : vector<80x256xf32>
    %6 = vector.extract_strided_slice %5 {offsets = [0, 0], sizes = [80, 128], strides = [1, 1]} : vector<80x256xf32> to vector<80x128xf32>
    %c0_5 = arith.constant 0 : index
    %c0_6 = arith.constant 0 : index
    %7 = vector.load %arg9[%c0_5, %c0_6] : memref<80x128xf32, #tpu.memory_space<vmem>>, vector<80x128xf32>
    tpu.vector_store %arg9[%c0_5, %c0_6], %6 {strides = array<i32>} : memref<80x128xf32, #tpu.memory_space<vmem>>, vector<80x128xf32>,
    %8 = vector.extract_strided_slice %5 {offsets = [0, 128], sizes = [80, 128], strides = [1, 1]} : vector<80x256xf32> to vector<80x128xf32>
    %c0_7 = arith.constant 0 : index
    %c0_8 = arith.constant 0 : index
    %9 = vector.load %arg10[%c0_7, %c0_8] : memref<80x128xf32, #tpu.memory_space<vmem>>, vector<80x128xf32>
    tpu.vector_store %arg10[%c0_7, %c0_8], %8 {strides = array<i32>} : memref<80x128xf32, #tpu.memory_space<vmem>>, vector<80x128xf32>,
    %c0_9 = arith.constant 0 : index
    %c0_10 = arith.constant 0 : index
    %10 = vector.load %arg2[%c0_9, %c0_10] : memref<32x128xf32, #tpu.memory_space<vmem>>, vector<32x128xf32>
    %c0_11 = arith.constant 0 : index
    %c0_12 = arith.constant 0 : index
    %11 = vector.load %arg3[%c0_11, %c0_12] : memref<32x128xf32, #tpu.memory_space<vmem>>, vector<32x128xf32>
    %cst_13 = arith.constant 0.000000e+00 : f32
    %12 = vector.broadcast %cst_13 : f32 to vector<8x32xf32>
    %c0_i32 = arith.constant 0 : i32
    %c8_i32 = arith.constant 8 : i32
    %13 = arith.muli %c0_i32, %c8_i32 : i32
    %14 = tpu.assume_multiple %13, 8 : i32
    %15 = arith.index_cast %14 : i32 to index
    %c0_14 = arith.constant 0 : index
    %16 = vector.load %arg9[%15, %c0_14] : memref<80x128xf32, #tpu.memory_space<vmem>>, vector<8x128xf32>
    %cst_15 = arith.constant dense<0.000000e+00> : vector<8x128xf32>
    %17 = tpu.matmul %12, %10, %cst_15 {dimension_numbers = #tpu.dot_dimension_numbers<[1], [0], [0], [1], [0, 0, 1, 1], [], []>} : vector<8x32xf32>, vector<32x128xf32>, vector<8x128xf32> -> vector<8x128xf32>
    %18 = arith.addf %16, %17 : vector<8x128xf32>
    %19 = arith.negf %18 : vector<8x128xf32>
    %20 = math.exp %19 : vector<8x128xf32>
    %cst_16 = arith.constant 1.000000e+00 : f32
    %21 = vector.broadcast %cst_16 : f32 to vector<8x128xf32>
    %22 = arith.addf %21, %20 : vector<8x128xf32>
    %23 = arith.divf %21, %22 : vector<8x128xf32>
    %24 = math.tanh %18 : vector<8x128xf32>
    %25 = vector.extract_strided_slice %23 {offsets = [0, 0], sizes = [8, 32], strides = [1, 1]} : vector<8x128xf32> to vector<8x32xf32>
    %26 = vector.extract_strided_slice %23 {offsets = [0, 32], sizes = [8, 32], strides = [1, 1]} : vector<8x128xf32> to vector<8x32xf32>
    %27 = vector.extract_strided_slice %24 {offsets = [0, 64], sizes = [8, 32], strides = [1, 1]} : vector<8x128xf32> to vector<8x32xf32>
    %28 = vector.extract_strided_slice %23 {offsets = [0, 96], sizes = [8, 32], strides = [1, 1]} : vector<8x128xf32> to vector<8x32xf32>
    %29 = arith.mulf %26, %12 : vector<8x32xf32>
    %30 = arith.mulf %25, %27 : vector<8x32xf32>
    %31 = arith.addf %29, %30 : vector<8x32xf32>
    %32 = math.tanh %31 : vector<8x32xf32>
    %33 = arith.mulf %28, %32 : vector<8x32xf32>
    %34 = arith.index_cast %14 : i32 to index
    %c0_17 = arith.constant 0 : index
    %35 = vector.load %arg11[%34, %c0_17] : memref<80x32xf32, #tpu.memory_space<vmem>>, vector<8x32xf32>
    tpu.vector_store %arg11[%34, %c0_17], %33 {strides = array<i32>} : memref<80x32xf32, #tpu.memory_space<vmem>>, vector<8x32xf32>,
    %c1_i32 = arith.constant 1 : i32
    %c8_i32_18 = arith.constant 8 : i32
    %36 = arith.muli %c1_i32, %c8_i32_18 : i32
    %37 = tpu.assume_multiple %36, 8 : i32
    %38 = arith.index_cast %37 : i32 to index
    %c0_19 = arith.constant 0 : index
    %39 = vector.load %arg9[%38, %c0_19] : memref<80x128xf32, #tpu.memory_space<vmem>>, vector<8x128xf32>
    %cst_20 = arith.constant dense<0.000000e+00> : vector<8x128xf32>
    %40 = tpu.matmul %33, %10, %cst_20 {dimension_numbers = #tpu.dot_dimension_numbers<[1], [0], [0], [1], [0, 0, 1, 1], [], []>} : vector<8x32xf32>, vector<32x128xf32>, vector<8x128xf32> -> vector<8x128xf32>
    %41 = arith.addf %39, %40 : vector<8x128xf32>
    %42 = arith.negf %41 : vector<8x128xf32>
    %43 = math.exp %42 : vector<8x128xf32>
    %cst_21 = arith.constant 1.000000e+00 : f32
    %44 = vector.broadcast %cst_21 : f32 to vector<8x128xf32>
    %45 = arith.addf %44, %43 : vector<8x128xf32>
    %46 = arith.divf %44, %45 : vector<8x128xf32>
    %47 = math.tanh %41 : vector<8x128xf32>
    %48 = vector.extract_strided_slice %46 {offsets = [0, 0], sizes = [8, 32], strides = [1, 1]} : vector<8x128xf32> to vector<8x32xf32>
    %49 = vector.extract_strided_slice %46 {offsets = [0, 32], sizes = [8, 32], strides = [1, 1]} : vector<8x128xf32> to vector<8x32xf32>
    %50 = vector.extract_strided_slice %47 {offsets = [0, 64], sizes = [8, 32], strides = [1, 1]} : vector<8x128xf32> to vector<8x32xf32>
    %51 = vector.extract_strided_slice %46 {offsets = [0, 96], sizes = [8, 32], strides = [1, 1]} : vector<8x128xf32> to vector<8x32xf32>
    %52 = arith.mulf %49, %31 : vector<8x32xf32>
    %53 = arith.mulf %48, %50 : vector<8x32xf32>
    %54 = arith.addf %52, %53 : vector<8x32xf32>
    %55 = math.tanh %54 : vector<8x32xf32>
    %56 = arith.mulf %51, %55 : vector<8x32xf32>
    %57 = arith.index_cast %37 : i32 to index
    %c0_22 = arith.constant 0 : index
    %58 = vector.load %arg11[%57, %c0_22] : memref<80x32xf32, #tpu.memory_space<vmem>>, vector<8x32xf32>
    tpu.vector_store %arg11[%57, %c0_22], %56 {strides = array<i32>} : memref<80x32xf32, #tpu.memory_space<vmem>>, vector<8x32xf32>,
    %c2_i32 = arith.constant 2 : i32
    %c8_i32_23 = arith.constant 8 : i32
    %59 = arith.muli %c2_i32, %c8_i32_23 : i32
    %60 = tpu.assume_multiple %59, 8 : i32
    %61 = arith.index_cast %60 : i32 to index
    %c0_24 = arith.constant 0 : index
    %62 = vector.load %arg9[%61, %c0_24] : memref<80x128xf32, #tpu.memory_space<vmem>>, vector<8x128xf32>
    %cst_25 = arith.constant dense<0.000000e+00> : vector<8x128xf32>
    %63 = tpu.matmul %56, %10, %cst_25 {dimension_numbers = #tpu.dot_dimension_numbers<[1], [0], [0], [1], [0, 0, 1, 1], [], []>} : vector<8x32xf32>, vector<32x128xf32>, vector<8x128xf32> -> vector<8x128xf32>
    %64 = arith.addf %62, %63 : vector<8x128xf32>
    %65 = arith.negf %64 : vector<8x128xf32>
    %66 = math.exp %65 : vector<8x128xf32>
    %cst_26 = arith.constant 1.000000e+00 : f32
    %67 = vector.broadcast %cst_26 : f32 to vector<8x128xf32>
    %68 = arith.addf %67, %66 : vector<8x128xf32>
    %69 = arith.divf %67, %68 : vector<8x128xf32>
    %70 = math.tanh %64 : vector<8x128xf32>
    %71 = vector.extract_strided_slice %69 {offsets = [0, 0], sizes = [8, 32], strides = [1, 1]} : vector<8x128xf32> to vector<8x32xf32>
    %72 = vector.extract_strided_slice %69 {offsets = [0, 32], sizes = [8, 32], strides = [1, 1]} : vector<8x128xf32> to vector<8x32xf32>
    %73 = vector.extract_strided_slice %70 {offsets = [0, 64], sizes = [8, 32], strides = [1, 1]} : vector<8x128xf32> to vector<8x32xf32>
    %74 = vector.extract_strided_slice %69 {offsets = [0, 96], sizes = [8, 32], strides = [1, 1]} : vector<8x128xf32> to vector<8x32xf32>
    %75 = arith.mulf %72, %54 : vector<8x32xf32>
    %76 = arith.mulf %71, %73 : vector<8x32xf32>
    %77 = arith.addf %75, %76 : vector<8x32xf32>
    %78 = math.tanh %77 : vector<8x32xf32>
    %79 = arith.mulf %74, %78 : vector<8x32xf32>
    %80 = arith.index_cast %60 : i32 to index
    %c0_27 = arith.constant 0 : index
    %81 = vector.load %arg11[%80, %c0_27] : memref<80x32xf32, #tpu.memory_space<vmem>>, vector<8x32xf32>
    tpu.vector_store %arg11[%80, %c0_27], %79 {strides = array<i32>} : memref<80x32xf32, #tpu.memory_space<vmem>>, vector<8x32xf32>,
    %c3_i32 = arith.constant 3 : i32
    %c8_i32_28 = arith.constant 8 : i32
    %82 = arith.muli %c3_i32, %c8_i32_28 : i32
    %83 = tpu.assume_multiple %82, 8 : i32
    %84 = arith.index_cast %83 : i32 to index
    %c0_29 = arith.constant 0 : index
    %85 = vector.load %arg9[%84, %c0_29] : memref<80x128xf32, #tpu.memory_space<vmem>>, vector<8x128xf32>
    %cst_30 = arith.constant dense<0.000000e+00> : vector<8x128xf32>
    %86 = tpu.matmul %79, %10, %cst_30 {dimension_numbers = #tpu.dot_dimension_numbers<[1], [0], [0], [1], [0, 0, 1, 1], [], []>} : vector<8x32xf32>, vector<32x128xf32>, vector<8x128xf32> -> vector<8x128xf32>
    %87 = arith.addf %85, %86 : vector<8x128xf32>
    %88 = arith.negf %87 : vector<8x128xf32>
    %89 = math.exp %88 : vector<8x128xf32>
    %cst_31 = arith.constant 1.000000e+00 : f32
    %90 = vector.broadcast %cst_31 : f32 to vector<8x128xf32>
    %91 = arith.addf %90, %89 : vector<8x128xf32>
    %92 = arith.divf %90, %91 : vector<8x128xf32>
    %93 = math.tanh %87 : vector<8x128xf32>
    %94 = vector.extract_strided_slice %92 {offsets = [0, 0], sizes = [8, 32], strides = [1, 1]} : vector<8x128xf32> to vector<8x32xf32>
    %95 = vector.extract_strided_slice %92 {offsets = [0, 32], sizes = [8, 32], strides = [1, 1]} : vector<8x128xf32> to vector<8x32xf32>
    %96 = vector.extract_strided_slice %93 {offsets = [0, 64], sizes = [8, 32], strides = [1, 1]} : vector<8x128xf32> to vector<8x32xf32>
    %97 = vector.extract_strided_slice %92 {offsets = [0, 96], sizes = [8, 32], strides = [1, 1]} : vector<8x128xf32> to vector<8x32xf32>
    %98 = arith.mulf %95, %77 : vector<8x32xf32>
    %99 = arith.mulf %94, %96 : vector<8x32xf32>
    %100 = arith.addf %98, %99 : vector<8x32xf32>
    %101 = math.tanh %100 : vector<8x32xf32>
    %102 = arith.mulf %97, %101 : vector<8x32xf32>
    %103 = arith.index_cast %83 : i32 to index
    %c0_32 = arith.constant 0 : index
    %104 = vector.load %arg11[%103, %c0_32] : memref<80x32xf32, #tpu.memory_space<vmem>>, vector<8x32xf32>
    tpu.vector_store %arg11[%103, %c0_32], %102 {strides = array<i32>} : memref<80x32xf32, #tpu.memory_space<vmem>>, vector<8x32xf32>,
    %c4_i32 = arith.constant 4 : i32
    %c8_i32_33 = arith.constant 8 : i32
    %105 = arith.muli %c4_i32, %c8_i32_33 : i32
    %106 = tpu.assume_multiple %105, 8 : i32
    %107 = arith.index_cast %106 : i32 to index
    %c0_34 = arith.constant 0 : index
    %108 = vector.load %arg9[%107, %c0_34] : memref<80x128xf32, #tpu.memory_space<vmem>>, vector<8x128xf32>
    %cst_35 = arith.constant dense<0.000000e+00> : vector<8x128xf32>
    %109 = tpu.matmul %102, %10, %cst_35 {dimension_numbers = #tpu.dot_dimension_numbers<[1], [0], [0], [1], [0, 0, 1, 1], [], []>} : vector<8x32xf32>, vector<32x128xf32>, vector<8x128xf32> -> vector<8x128xf32>
    %110 = arith.addf %108, %109 : vector<8x128xf32>
    %111 = arith.negf %110 : vector<8x128xf32>
    %112 = math.exp %111 : vector<8x128xf32>
    %cst_36 = arith.constant 1.000000e+00 : f32
    %113 = vector.broadcast %cst_36 : f32 to vector<8x128xf32>
    %114 = arith.addf %113, %112 : vector<8x128xf32>
    %115 = arith.divf %113, %114 : vector<8x128xf32>
    %116 = math.tanh %110 : vector<8x128xf32>
    %117 = vector.extract_strided_slice %115 {offsets = [0, 0], sizes = [8, 32], strides = [1, 1]} : vector<8x128xf32> to vector<8x32xf32>
    %118 = vector.extract_strided_slice %115 {offsets = [0, 32], sizes = [8, 32], strides = [1, 1]} : vector<8x128xf32> to vector<8x32xf32>
    %119 = vector.extract_strided_slice %116 {offsets = [0, 64], sizes = [8, 32], strides = [1, 1]} : vector<8x128xf32> to vector<8x32xf32>
    %120 = vector.extract_strided_slice %115 {offsets = [0, 96], sizes = [8, 32], strides = [1, 1]} : vector<8x128xf32> to vector<8x32xf32>
    %121 = arith.mulf %118, %100 : vector<8x32xf32>
    %122 = arith.mulf %117, %119 : vector<8x32xf32>
    %123 = arith.addf %121, %122 : vector<8x32xf32>
    %124 = math.tanh %123 : vector<8x32xf32>
    %125 = arith.mulf %120, %124 : vector<8x32xf32>
    %126 = arith.index_cast %106 : i32 to index
    %c0_37 = arith.constant 0 : index
    %127 = vector.load %arg11[%126, %c0_37] : memref<80x32xf32, #tpu.memory_space<vmem>>, vector<8x32xf32>
    tpu.vector_store %arg11[%126, %c0_37], %125 {strides = array<i32>} : memref<80x32xf32, #tpu.memory_space<vmem>>, vector<8x32xf32>,
    %c5_i32 = arith.constant 5 : i32
    %c8_i32_38 = arith.constant 8 : i32
    %128 = arith.muli %c5_i32, %c8_i32_38 : i32
    %129 = tpu.assume_multiple %128, 8 : i32
    %130 = arith.index_cast %129 : i32 to index
    %c0_39 = arith.constant 0 : index
    %131 = vector.load %arg9[%130, %c0_39] : memref<80x128xf32, #tpu.memory_space<vmem>>, vector<8x128xf32>
    %cst_40 = arith.constant dense<0.000000e+00> : vector<8x128xf32>
    %132 = tpu.matmul %125, %10, %cst_40 {dimension_numbers = #tpu.dot_dimension_numbers<[1], [0], [0], [1], [0, 0, 1, 1], [], []>} : vector<8x32xf32>, vector<32x128xf32>, vector<8x128xf32> -> vector<8x128xf32>
    %133 = arith.addf %131, %132 : vector<8x128xf32>
    %134 = arith.negf %133 : vector<8x128xf32>
    %135 = math.exp %134 : vector<8x128xf32>
    %cst_41 = arith.constant 1.000000e+00 : f32
    %136 = vector.broadcast %cst_41 : f32 to vector<8x128xf32>
    %137 = arith.addf %136, %135 : vector<8x128xf32>
    %138 = arith.divf %136, %137 : vector<8x128xf32>
    %139 = math.tanh %133 : vector<8x128xf32>
    %140 = vector.extract_strided_slice %138 {offsets = [0, 0], sizes = [8, 32], strides = [1, 1]} : vector<8x128xf32> to vector<8x32xf32>
    %141 = vector.extract_strided_slice %138 {offsets = [0, 32], sizes = [8, 32], strides = [1, 1]} : vector<8x128xf32> to vector<8x32xf32>
    %142 = vector.extract_strided_slice %139 {offsets = [0, 64], sizes = [8, 32], strides = [1, 1]} : vector<8x128xf32> to vector<8x32xf32>
    %143 = vector.extract_strided_slice %138 {offsets = [0, 96], sizes = [8, 32], strides = [1, 1]} : vector<8x128xf32> to vector<8x32xf32>
    %144 = arith.mulf %141, %123 : vector<8x32xf32>
    %145 = arith.mulf %140, %142 : vector<8x32xf32>
    %146 = arith.addf %144, %145 : vector<8x32xf32>
    %147 = math.tanh %146 : vector<8x32xf32>
    %148 = arith.mulf %143, %147 : vector<8x32xf32>
    %149 = arith.index_cast %129 : i32 to index
    %c0_42 = arith.constant 0 : index
    %150 = vector.load %arg11[%149, %c0_42] : memref<80x32xf32, #tpu.memory_space<vmem>>, vector<8x32xf32>
    tpu.vector_store %arg11[%149, %c0_42], %148 {strides = array<i32>} : memref<80x32xf32, #tpu.memory_space<vmem>>, vector<8x32xf32>,
    %c6_i32 = arith.constant 6 : i32
    %c8_i32_43 = arith.constant 8 : i32
    %151 = arith.muli %c6_i32, %c8_i32_43 : i32
    %152 = tpu.assume_multiple %151, 8 : i32
    %153 = arith.index_cast %152 : i32 to index
    %c0_44 = arith.constant 0 : index
    %154 = vector.load %arg9[%153, %c0_44] : memref<80x128xf32, #tpu.memory_space<vmem>>, vector<8x128xf32>
    %cst_45 = arith.constant dense<0.000000e+00> : vector<8x128xf32>
    %155 = tpu.matmul %148, %10, %cst_45 {dimension_numbers = #tpu.dot_dimension_numbers<[1], [0], [0], [1], [0, 0, 1, 1], [], []>} : vector<8x32xf32>, vector<32x128xf32>, vector<8x128xf32> -> vector<8x128xf32>
    %156 = arith.addf %154, %155 : vector<8x128xf32>
    %157 = arith.negf %156 : vector<8x128xf32>
    %158 = math.exp %157 : vector<8x128xf32>
    %cst_46 = arith.constant 1.000000e+00 : f32
    %159 = vector.broadcast %cst_46 : f32 to vector<8x128xf32>
    %160 = arith.addf %159, %158 : vector<8x128xf32>
    %161 = arith.divf %159, %160 : vector<8x128xf32>
    %162 = math.tanh %156 : vector<8x128xf32>
    %163 = vector.extract_strided_slice %161 {offsets = [0, 0], sizes = [8, 32], strides = [1, 1]} : vector<8x128xf32> to vector<8x32xf32>
    %164 = vector.extract_strided_slice %161 {offsets = [0, 32], sizes = [8, 32], strides = [1, 1]} : vector<8x128xf32> to vector<8x32xf32>
    %165 = vector.extract_strided_slice %162 {offsets = [0, 64], sizes = [8, 32], strides = [1, 1]} : vector<8x128xf32> to vector<8x32xf32>
    %166 = vector.extract_strided_slice %161 {offsets = [0, 96], sizes = [8, 32], strides = [1, 1]} : vector<8x128xf32> to vector<8x32xf32>
    %167 = arith.mulf %164, %146 : vector<8x32xf32>
    %168 = arith.mulf %163, %165 : vector<8x32xf32>
    %169 = arith.addf %167, %168 : vector<8x32xf32>
    %170 = math.tanh %169 : vector<8x32xf32>
    %171 = arith.mulf %166, %170 : vector<8x32xf32>
    %172 = arith.index_cast %152 : i32 to index
    %c0_47 = arith.constant 0 : index
    %173 = vector.load %arg11[%172, %c0_47] : memref<80x32xf32, #tpu.memory_space<vmem>>, vector<8x32xf32>
    tpu.vector_store %arg11[%172, %c0_47], %171 {strides = array<i32>} : memref<80x32xf32, #tpu.memory_space<vmem>>, vector<8x32xf32>,
    %c7_i32 = arith.constant 7 : i32
    %c8_i32_48 = arith.constant 8 : i32
    %174 = arith.muli %c7_i32, %c8_i32_48 : i32
    %175 = tpu.assume_multiple %174, 8 : i32
    %176 = arith.index_cast %175 : i32 to index
    %c0_49 = arith.constant 0 : index
    %177 = vector.load %arg9[%176, %c0_49] : memref<80x128xf32, #tpu.memory_space<vmem>>, vector<8x128xf32>
    %cst_50 = arith.constant dense<0.000000e+00> : vector<8x128xf32>
    %178 = tpu.matmul %171, %10, %cst_50 {dimension_numbers = #tpu.dot_dimension_numbers<[1], [0], [0], [1], [0, 0, 1, 1], [], []>} : vector<8x32xf32>, vector<32x128xf32>, vector<8x128xf32> -> vector<8x128xf32>
    %179 = arith.addf %177, %178 : vector<8x128xf32>
    %180 = arith.negf %179 : vector<8x128xf32>
    %181 = math.exp %180 : vector<8x128xf32>
    %cst_51 = arith.constant 1.000000e+00 : f32
    %182 = vector.broadcast %cst_51 : f32 to vector<8x128xf32>
    %183 = arith.addf %182, %181 : vector<8x128xf32>
    %184 = arith.divf %182, %183 : vector<8x128xf32>
    %185 = math.tanh %179 : vector<8x128xf32>
    %186 = vector.extract_strided_slice %184 {offsets = [0, 0], sizes = [8, 32], strides = [1, 1]} : vector<8x128xf32> to vector<8x32xf32>
    %187 = vector.extract_strided_slice %184 {offsets = [0, 32], sizes = [8, 32], strides = [1, 1]} : vector<8x128xf32> to vector<8x32xf32>
    %188 = vector.extract_strided_slice %185 {offsets = [0, 64], sizes = [8, 32], strides = [1, 1]} : vector<8x128xf32> to vector<8x32xf32>
    %189 = vector.extract_strided_slice %184 {offsets = [0, 96], sizes = [8, 32], strides = [1, 1]} : vector<8x128xf32> to vector<8x32xf32>
    %190 = arith.mulf %187, %169 : vector<8x32xf32>
    %191 = arith.mulf %186, %188 : vector<8x32xf32>
    %192 = arith.addf %190, %191 : vector<8x32xf32>
    %193 = math.tanh %192 : vector<8x32xf32>
    %194 = arith.mulf %189, %193 : vector<8x32xf32>
    %195 = arith.index_cast %175 : i32 to index
    %c0_52 = arith.constant 0 : index
    %196 = vector.load %arg11[%195, %c0_52] : memref<80x32xf32, #tpu.memory_space<vmem>>, vector<8x32xf32>
    tpu.vector_store %arg11[%195, %c0_52], %194 {strides = array<i32>} : memref<80x32xf32, #tpu.memory_space<vmem>>, vector<8x32xf32>,
    %c8_i32_53 = arith.constant 8 : i32
    %c8_i32_54 = arith.constant 8 : i32
    %197 = arith.muli %c8_i32_53, %c8_i32_54 : i32
    %198 = tpu.assume_multiple %197, 8 : i32
    %199 = arith.index_cast %198 : i32 to index
    %c0_55 = arith.constant 0 : index
    %200 = vector.load %arg9[%199, %c0_55] : memref<80x128xf32, #tpu.memory_space<vmem>>, vector<8x128xf32>
    %cst_56 = arith.constant dense<0.000000e+00> : vector<8x128xf32>
    %201 = tpu.matmul %194, %10, %cst_56 {dimension_numbers = #tpu.dot_dimension_numbers<[1], [0], [0], [1], [0, 0, 1, 1], [], []>} : vector<8x32xf32>, vector<32x128xf32>, vector<8x128xf32> -> vector<8x128xf32>
    %202 = arith.addf %200, %201 : vector<8x128xf32>
    %203 = arith.negf %202 : vector<8x128xf32>
    %204 = math.exp %203 : vector<8x128xf32>
    %cst_57 = arith.constant 1.000000e+00 : f32
    %205 = vector.broadcast %cst_57 : f32 to vector<8x128xf32>
    %206 = arith.addf %205, %204 : vector<8x128xf32>
    %207 = arith.divf %205, %206 : vector<8x128xf32>
    %208 = math.tanh %202 : vector<8x128xf32>
    %209 = vector.extract_strided_slice %207 {offsets = [0, 0], sizes = [8, 32], strides = [1, 1]} : vector<8x128xf32> to vector<8x32xf32>
    %210 = vector.extract_strided_slice %207 {offsets = [0, 32], sizes = [8, 32], strides = [1, 1]} : vector<8x128xf32> to vector<8x32xf32>
    %211 = vector.extract_strided_slice %208 {offsets = [0, 64], sizes = [8, 32], strides = [1, 1]} : vector<8x128xf32> to vector<8x32xf32>
    %212 = vector.extract_strided_slice %207 {offsets = [0, 96], sizes = [8, 32], strides = [1, 1]} : vector<8x128xf32> to vector<8x32xf32>
    %213 = arith.mulf %210, %192 : vector<8x32xf32>
    %214 = arith.mulf %209, %211 : vector<8x32xf32>
    %215 = arith.addf %213, %214 : vector<8x32xf32>
    %216 = math.tanh %215 : vector<8x32xf32>
    %217 = arith.mulf %212, %216 : vector<8x32xf32>
    %218 = arith.index_cast %198 : i32 to index
    %c0_58 = arith.constant 0 : index
    %219 = vector.load %arg11[%218, %c0_58] : memref<80x32xf32, #tpu.memory_space<vmem>>, vector<8x32xf32>
    tpu.vector_store %arg11[%218, %c0_58], %217 {strides = array<i32>} : memref<80x32xf32, #tpu.memory_space<vmem>>, vector<8x32xf32>,
    %c9_i32 = arith.constant 9 : i32
    %c8_i32_59 = arith.constant 8 : i32
    %220 = arith.muli %c9_i32, %c8_i32_59 : i32
    %221 = tpu.assume_multiple %220, 8 : i32
    %222 = arith.index_cast %221 : i32 to index
    %c0_60 = arith.constant 0 : index
    %223 = vector.load %arg9[%222, %c0_60] : memref<80x128xf32, #tpu.memory_space<vmem>>, vector<8x128xf32>
    %cst_61 = arith.constant dense<0.000000e+00> : vector<8x128xf32>
    %224 = tpu.matmul %217, %10, %cst_61 {dimension_numbers = #tpu.dot_dimension_numbers<[1], [0], [0], [1], [0, 0, 1, 1], [], []>} : vector<8x32xf32>, vector<32x128xf32>, vector<8x128xf32> -> vector<8x128xf32>
    %225 = arith.addf %223, %224 : vector<8x128xf32>
    %226 = arith.negf %225 : vector<8x128xf32>
    %227 = math.exp %226 : vector<8x128xf32>
    %cst_62 = arith.constant 1.000000e+00 : f32
    %228 = vector.broadcast %cst_62 : f32 to vector<8x128xf32>
    %229 = arith.addf %228, %227 : vector<8x128xf32>
    %230 = arith.divf %228, %229 : vector<8x128xf32>
    %231 = math.tanh %225 : vector<8x128xf32>
    %232 = vector.extract_strided_slice %230 {offsets = [0, 0], sizes = [8, 32], strides = [1, 1]} : vector<8x128xf32> to vector<8x32xf32>
    %233 = vector.extract_strided_slice %230 {offsets = [0, 32], sizes = [8, 32], strides = [1, 1]} : vector<8x128xf32> to vector<8x32xf32>
    %234 = vector.extract_strided_slice %231 {offsets = [0, 64], sizes = [8, 32], strides = [1, 1]} : vector<8x128xf32> to vector<8x32xf32>
    %235 = vector.extract_strided_slice %230 {offsets = [0, 96], sizes = [8, 32], strides = [1, 1]} : vector<8x128xf32> to vector<8x32xf32>
    %236 = arith.mulf %233, %215 : vector<8x32xf32>
    %237 = arith.mulf %232, %234 : vector<8x32xf32>
    %238 = arith.addf %236, %237 : vector<8x32xf32>
    %239 = math.tanh %238 : vector<8x32xf32>
    %240 = arith.mulf %235, %239 : vector<8x32xf32>
    %241 = arith.index_cast %221 : i32 to index
    %c0_63 = arith.constant 0 : index
    %242 = vector.load %arg11[%241, %c0_63] : memref<80x32xf32, #tpu.memory_space<vmem>>, vector<8x32xf32>
    tpu.vector_store %arg11[%241, %c0_63], %240 {strides = array<i32>} : memref<80x32xf32, #tpu.memory_space<vmem>>, vector<8x32xf32>,
    %c10_i32 = arith.constant 10 : i32
    %c0_i32_64 = arith.constant 0 : i32
    %c9_i32_65 = arith.constant 9 : i32
    %243 = arith.subi %c9_i32_65, %c0_i32_64 : i32
    %c8_i32_66 = arith.constant 8 : i32
    %244 = arith.muli %243, %c8_i32_66 : i32
    %245 = tpu.assume_multiple %244, 8 : i32
    %246 = arith.index_cast %245 : i32 to index
    %c0_67 = arith.constant 0 : index
    %247 = vector.load %arg10[%246, %c0_67] : memref<80x128xf32, #tpu.memory_space<vmem>>, vector<8x128xf32>
    %cst_68 = arith.constant dense<0.000000e+00> : vector<8x128xf32>
    %248 = tpu.matmul %12, %11, %cst_68 {dimension_numbers = #tpu.dot_dimension_numbers<[1], [0], [0], [1], [0, 0, 1, 1], [], []>} : vector<8x32xf32>, vector<32x128xf32>, vector<8x128xf32> -> vector<8x128xf32>
    %249 = arith.addf %247, %248 : vector<8x128xf32>
    %250 = arith.negf %249 : vector<8x128xf32>
    %251 = math.exp %250 : vector<8x128xf32>
    %cst_69 = arith.constant 1.000000e+00 : f32
    %252 = vector.broadcast %cst_69 : f32 to vector<8x128xf32>
    %253 = arith.addf %252, %251 : vector<8x128xf32>
    %254 = arith.divf %252, %253 : vector<8x128xf32>
    %255 = math.tanh %249 : vector<8x128xf32>
    %256 = vector.extract_strided_slice %254 {offsets = [0, 0], sizes = [8, 32], strides = [1, 1]} : vector<8x128xf32> to vector<8x32xf32>
    %257 = vector.extract_strided_slice %254 {offsets = [0, 32], sizes = [8, 32], strides = [1, 1]} : vector<8x128xf32> to vector<8x32xf32>
    %258 = vector.extract_strided_slice %255 {offsets = [0, 64], sizes = [8, 32], strides = [1, 1]} : vector<8x128xf32> to vector<8x32xf32>
    %259 = vector.extract_strided_slice %254 {offsets = [0, 96], sizes = [8, 32], strides = [1, 1]} : vector<8x128xf32> to vector<8x32xf32>
    %260 = arith.mulf %257, %12 : vector<8x32xf32>
    %261 = arith.mulf %256, %258 : vector<8x32xf32>
    %262 = arith.addf %260, %261 : vector<8x32xf32>
    %263 = math.tanh %262 : vector<8x32xf32>
    %264 = arith.mulf %259, %263 : vector<8x32xf32>
    %265 = arith.index_cast %245 : i32 to index
    %c0_70 = arith.constant 0 : index
    %266 = vector.load %arg12[%265, %c0_70] : memref<80x32xf32, #tpu.memory_space<vmem>>, vector<8x32xf32>
    tpu.vector_store %arg12[%265, %c0_70], %264 {strides = array<i32>} : memref<80x32xf32, #tpu.memory_space<vmem>>, vector<8x32xf32>,
    %c1_i32_71 = arith.constant 1 : i32
    %c9_i32_72 = arith.constant 9 : i32
    %267 = arith.subi %c9_i32_72, %c1_i32_71 : i32
    %c8_i32_73 = arith.constant 8 : i32
    %268 = arith.muli %267, %c8_i32_73 : i32
    %269 = tpu.assume_multiple %268, 8 : i32
    %270 = arith.index_cast %269 : i32 to index
    %c0_74 = arith.constant 0 : index
    %271 = vector.load %arg10[%270, %c0_74] : memref<80x128xf32, #tpu.memory_space<vmem>>, vector<8x128xf32>
    %cst_75 = arith.constant dense<0.000000e+00> : vector<8x128xf32>
    %272 = tpu.matmul %264, %11, %cst_75 {dimension_numbers = #tpu.dot_dimension_numbers<[1], [0], [0], [1], [0, 0, 1, 1], [], []>} : vector<8x32xf32>, vector<32x128xf32>, vector<8x128xf32> -> vector<8x128xf32>
    %273 = arith.addf %271, %272 : vector<8x128xf32>
    %274 = arith.negf %273 : vector<8x128xf32>
    %275 = math.exp %274 : vector<8x128xf32>
    %cst_76 = arith.constant 1.000000e+00 : f32
    %276 = vector.broadcast %cst_76 : f32 to vector<8x128xf32>
    %277 = arith.addf %276, %275 : vector<8x128xf32>
    %278 = arith.divf %276, %277 : vector<8x128xf32>
    %279 = math.tanh %273 : vector<8x128xf32>
    %280 = vector.extract_strided_slice %278 {offsets = [0, 0], sizes = [8, 32], strides = [1, 1]} : vector<8x128xf32> to vector<8x32xf32>
    %281 = vector.extract_strided_slice %278 {offsets = [0, 32], sizes = [8, 32], strides = [1, 1]} : vector<8x128xf32> to vector<8x32xf32>
    %282 = vector.extract_strided_slice %279 {offsets = [0, 64], sizes = [8, 32], strides = [1, 1]} : vector<8x128xf32> to vector<8x32xf32>
    %283 = vector.extract_strided_slice %278 {offsets = [0, 96], sizes = [8, 32], strides = [1, 1]} : vector<8x128xf32> to vector<8x32xf32>
    %284 = arith.mulf %281, %262 : vector<8x32xf32>
    %285 = arith.mulf %280, %282 : vector<8x32xf32>
    %286 = arith.addf %284, %285 : vector<8x32xf32>
    %287 = math.tanh %286 : vector<8x32xf32>
    %288 = arith.mulf %283, %287 : vector<8x32xf32>
    %289 = arith.index_cast %269 : i32 to index
    %c0_77 = arith.constant 0 : index
    %290 = vector.load %arg12[%289, %c0_77] : memref<80x32xf32, #tpu.memory_space<vmem>>, vector<8x32xf32>
    tpu.vector_store %arg12[%289, %c0_77], %288 {strides = array<i32>} : memref<80x32xf32, #tpu.memory_space<vmem>>, vector<8x32xf32>,
    %c2_i32_78 = arith.constant 2 : i32
    %c9_i32_79 = arith.constant 9 : i32
    %291 = arith.subi %c9_i32_79, %c2_i32_78 : i32
    %c8_i32_80 = arith.constant 8 : i32
    %292 = arith.muli %291, %c8_i32_80 : i32
    %293 = tpu.assume_multiple %292, 8 : i32
    %294 = arith.index_cast %293 : i32 to index
    %c0_81 = arith.constant 0 : index
    %295 = vector.load %arg10[%294, %c0_81] : memref<80x128xf32, #tpu.memory_space<vmem>>, vector<8x128xf32>
    %cst_82 = arith.constant dense<0.000000e+00> : vector<8x128xf32>
    %296 = tpu.matmul %288, %11, %cst_82 {dimension_numbers = #tpu.dot_dimension_numbers<[1], [0], [0], [1], [0, 0, 1, 1], [], []>} : vector<8x32xf32>, vector<32x128xf32>, vector<8x128xf32> -> vector<8x128xf32>
    %297 = arith.addf %295, %296 : vector<8x128xf32>
    %298 = arith.negf %297 : vector<8x128xf32>
    %299 = math.exp %298 : vector<8x128xf32>
    %cst_83 = arith.constant 1.000000e+00 : f32
    %300 = vector.broadcast %cst_83 : f32 to vector<8x128xf32>
    %301 = arith.addf %300, %299 : vector<8x128xf32>
    %302 = arith.divf %300, %301 : vector<8x128xf32>
    %303 = math.tanh %297 : vector<8x128xf32>
    %304 = vector.extract_strided_slice %302 {offsets = [0, 0], sizes = [8, 32], strides = [1, 1]} : vector<8x128xf32> to vector<8x32xf32>
    %305 = vector.extract_strided_slice %302 {offsets = [0, 32], sizes = [8, 32], strides = [1, 1]} : vector<8x128xf32> to vector<8x32xf32>
    %306 = vector.extract_strided_slice %303 {offsets = [0, 64], sizes = [8, 32], strides = [1, 1]} : vector<8x128xf32> to vector<8x32xf32>
    %307 = vector.extract_strided_slice %302 {offsets = [0, 96], sizes = [8, 32], strides = [1, 1]} : vector<8x128xf32> to vector<8x32xf32>
    %308 = arith.mulf %305, %286 : vector<8x32xf32>
    %309 = arith.mulf %304, %306 : vector<8x32xf32>
    %310 = arith.addf %308, %309 : vector<8x32xf32>
    %311 = math.tanh %310 : vector<8x32xf32>
    %312 = arith.mulf %307, %311 : vector<8x32xf32>
    %313 = arith.index_cast %293 : i32 to index
    %c0_84 = arith.constant 0 : index
    %314 = vector.load %arg12[%313, %c0_84] : memref<80x32xf32, #tpu.memory_space<vmem>>, vector<8x32xf32>
    tpu.vector_store %arg12[%313, %c0_84], %312 {strides = array<i32>} : memref<80x32xf32, #tpu.memory_space<vmem>>, vector<8x32xf32>,
    %c3_i32_85 = arith.constant 3 : i32
    %c9_i32_86 = arith.constant 9 : i32
    %315 = arith.subi %c9_i32_86, %c3_i32_85 : i32
    %c8_i32_87 = arith.constant 8 : i32
    %316 = arith.muli %315, %c8_i32_87 : i32
    %317 = tpu.assume_multiple %316, 8 : i32
    %318 = arith.index_cast %317 : i32 to index
    %c0_88 = arith.constant 0 : index
    %319 = vector.load %arg10[%318, %c0_88] : memref<80x128xf32, #tpu.memory_space<vmem>>, vector<8x128xf32>
    %cst_89 = arith.constant dense<0.000000e+00> : vector<8x128xf32>
    %320 = tpu.matmul %312, %11, %cst_89 {dimension_numbers = #tpu.dot_dimension_numbers<[1], [0], [0], [1], [0, 0, 1, 1], [], []>} : vector<8x32xf32>, vector<32x128xf32>, vector<8x128xf32> -> vector<8x128xf32>
    %321 = arith.addf %319, %320 : vector<8x128xf32>
    %322 = arith.negf %321 : vector<8x128xf32>
    %323 = math.exp %322 : vector<8x128xf32>
    %cst_90 = arith.constant 1.000000e+00 : f32
    %324 = vector.broadcast %cst_90 : f32 to vector<8x128xf32>
    %325 = arith.addf %324, %323 : vector<8x128xf32>
    %326 = arith.divf %324, %325 : vector<8x128xf32>
    %327 = math.tanh %321 : vector<8x128xf32>
    %328 = vector.extract_strided_slice %326 {offsets = [0, 0], sizes = [8, 32], strides = [1, 1]} : vector<8x128xf32> to vector<8x32xf32>
    %329 = vector.extract_strided_slice %326 {offsets = [0, 32], sizes = [8, 32], strides = [1, 1]} : vector<8x128xf32> to vector<8x32xf32>
    %330 = vector.extract_strided_slice %327 {offsets = [0, 64], sizes = [8, 32], strides = [1, 1]} : vector<8x128xf32> to vector<8x32xf32>
    %331 = vector.extract_strided_slice %326 {offsets = [0, 96], sizes = [8, 32], strides = [1, 1]} : vector<8x128xf32> to vector<8x32xf32>
    %332 = arith.mulf %329, %310 : vector<8x32xf32>
    %333 = arith.mulf %328, %330 : vector<8x32xf32>
    %334 = arith.addf %332, %333 : vector<8x32xf32>
    %335 = math.tanh %334 : vector<8x32xf32>
    %336 = arith.mulf %331, %335 : vector<8x32xf32>
    %337 = arith.index_cast %317 : i32 to index
    %c0_91 = arith.constant 0 : index
    %338 = vector.load %arg12[%337, %c0_91] : memref<80x32xf32, #tpu.memory_space<vmem>>, vector<8x32xf32>
    tpu.vector_store %arg12[%337, %c0_91], %336 {strides = array<i32>} : memref<80x32xf32, #tpu.memory_space<vmem>>, vector<8x32xf32>,
    %c4_i32_92 = arith.constant 4 : i32
    %c9_i32_93 = arith.constant 9 : i32
    %339 = arith.subi %c9_i32_93, %c4_i32_92 : i32
    %c8_i32_94 = arith.constant 8 : i32
    %340 = arith.muli %339, %c8_i32_94 : i32
    %341 = tpu.assume_multiple %340, 8 : i32
    %342 = arith.index_cast %341 : i32 to index
    %c0_95 = arith.constant 0 : index
    %343 = vector.load %arg10[%342, %c0_95] : memref<80x128xf32, #tpu.memory_space<vmem>>, vector<8x128xf32>
    %cst_96 = arith.constant dense<0.000000e+00> : vector<8x128xf32>
    %344 = tpu.matmul %336, %11, %cst_96 {dimension_numbers = #tpu.dot_dimension_numbers<[1], [0], [0], [1], [0, 0, 1, 1], [], []>} : vector<8x32xf32>, vector<32x128xf32>, vector<8x128xf32> -> vector<8x128xf32>
    %345 = arith.addf %343, %344 : vector<8x128xf32>
    %346 = arith.negf %345 : vector<8x128xf32>
    %347 = math.exp %346 : vector<8x128xf32>
    %cst_97 = arith.constant 1.000000e+00 : f32
    %348 = vector.broadcast %cst_97 : f32 to vector<8x128xf32>
    %349 = arith.addf %348, %347 : vector<8x128xf32>
    %350 = arith.divf %348, %349 : vector<8x128xf32>
    %351 = math.tanh %345 : vector<8x128xf32>
    %352 = vector.extract_strided_slice %350 {offsets = [0, 0], sizes = [8, 32], strides = [1, 1]} : vector<8x128xf32> to vector<8x32xf32>
    %353 = vector.extract_strided_slice %350 {offsets = [0, 32], sizes = [8, 32], strides = [1, 1]} : vector<8x128xf32> to vector<8x32xf32>
    %354 = vector.extract_strided_slice %351 {offsets = [0, 64], sizes = [8, 32], strides = [1, 1]} : vector<8x128xf32> to vector<8x32xf32>
    %355 = vector.extract_strided_slice %350 {offsets = [0, 96], sizes = [8, 32], strides = [1, 1]} : vector<8x128xf32> to vector<8x32xf32>
    %356 = arith.mulf %353, %334 : vector<8x32xf32>
    %357 = arith.mulf %352, %354 : vector<8x32xf32>
    %358 = arith.addf %356, %357 : vector<8x32xf32>
    %359 = math.tanh %358 : vector<8x32xf32>
    %360 = arith.mulf %355, %359 : vector<8x32xf32>
    %361 = arith.index_cast %341 : i32 to index
    %c0_98 = arith.constant 0 : index
    %362 = vector.load %arg12[%361, %c0_98] : memref<80x32xf32, #tpu.memory_space<vmem>>, vector<8x32xf32>
    tpu.vector_store %arg12[%361, %c0_98], %360 {strides = array<i32>} : memref<80x32xf32, #tpu.memory_space<vmem>>, vector<8x32xf32>,
    %c5_i32_99 = arith.constant 5 : i32
    %c9_i32_100 = arith.constant 9 : i32
    %363 = arith.subi %c9_i32_100, %c5_i32_99 : i32
    %c8_i32_101 = arith.constant 8 : i32
    %364 = arith.muli %363, %c8_i32_101 : i32
    %365 = tpu.assume_multiple %364, 8 : i32
    %366 = arith.index_cast %365 : i32 to index
    %c0_102 = arith.constant 0 : index
    %367 = vector.load %arg10[%366, %c0_102] : memref<80x128xf32, #tpu.memory_space<vmem>>, vector<8x128xf32>
    %cst_103 = arith.constant dense<0.000000e+00> : vector<8x128xf32>
    %368 = tpu.matmul %360, %11, %cst_103 {dimension_numbers = #tpu.dot_dimension_numbers<[1], [0], [0], [1], [0, 0, 1, 1], [], []>} : vector<8x32xf32>, vector<32x128xf32>, vector<8x128xf32> -> vector<8x128xf32>
    %369 = arith.addf %367, %368 : vector<8x128xf32>
    %370 = arith.negf %369 : vector<8x128xf32>
    %371 = math.exp %370 : vector<8x128xf32>
    %cst_104 = arith.constant 1.000000e+00 : f32
    %372 = vector.broadcast %cst_104 : f32 to vector<8x128xf32>
    %373 = arith.addf %372, %371 : vector<8x128xf32>
    %374 = arith.divf %372, %373 : vector<8x128xf32>
    %375 = math.tanh %369 : vector<8x128xf32>
    %376 = vector.extract_strided_slice %374 {offsets = [0, 0], sizes = [8, 32], strides = [1, 1]} : vector<8x128xf32> to vector<8x32xf32>
    %377 = vector.extract_strided_slice %374 {offsets = [0, 32], sizes = [8, 32], strides = [1, 1]} : vector<8x128xf32> to vector<8x32xf32>
    %378 = vector.extract_strided_slice %375 {offsets = [0, 64], sizes = [8, 32], strides = [1, 1]} : vector<8x128xf32> to vector<8x32xf32>
    %379 = vector.extract_strided_slice %374 {offsets = [0, 96], sizes = [8, 32], strides = [1, 1]} : vector<8x128xf32> to vector<8x32xf32>
    %380 = arith.mulf %377, %358 : vector<8x32xf32>
    %381 = arith.mulf %376, %378 : vector<8x32xf32>
    %382 = arith.addf %380, %381 : vector<8x32xf32>
    %383 = math.tanh %382 : vector<8x32xf32>
    %384 = arith.mulf %379, %383 : vector<8x32xf32>
    %385 = arith.index_cast %365 : i32 to index
    %c0_105 = arith.constant 0 : index
    %386 = vector.load %arg12[%385, %c0_105] : memref<80x32xf32, #tpu.memory_space<vmem>>, vector<8x32xf32>
    tpu.vector_store %arg12[%385, %c0_105], %384 {strides = array<i32>} : memref<80x32xf32, #tpu.memory_space<vmem>>, vector<8x32xf32>,
    %c6_i32_106 = arith.constant 6 : i32
    %c9_i32_107 = arith.constant 9 : i32
    %387 = arith.subi %c9_i32_107, %c6_i32_106 : i32
    %c8_i32_108 = arith.constant 8 : i32
    %388 = arith.muli %387, %c8_i32_108 : i32
    %389 = tpu.assume_multiple %388, 8 : i32
    %390 = arith.index_cast %389 : i32 to index
    %c0_109 = arith.constant 0 : index
    %391 = vector.load %arg10[%390, %c0_109] : memref<80x128xf32, #tpu.memory_space<vmem>>, vector<8x128xf32>
    %cst_110 = arith.constant dense<0.000000e+00> : vector<8x128xf32>
    %392 = tpu.matmul %384, %11, %cst_110 {dimension_numbers = #tpu.dot_dimension_numbers<[1], [0], [0], [1], [0, 0, 1, 1], [], []>} : vector<8x32xf32>, vector<32x128xf32>, vector<8x128xf32> -> vector<8x128xf32>
    %393 = arith.addf %391, %392 : vector<8x128xf32>
    %394 = arith.negf %393 : vector<8x128xf32>
    %395 = math.exp %394 : vector<8x128xf32>
    %cst_111 = arith.constant 1.000000e+00 : f32
    %396 = vector.broadcast %cst_111 : f32 to vector<8x128xf32>
    %397 = arith.addf %396, %395 : vector<8x128xf32>
    %398 = arith.divf %396, %397 : vector<8x128xf32>
    %399 = math.tanh %393 : vector<8x128xf32>
    %400 = vector.extract_strided_slice %398 {offsets = [0, 0], sizes = [8, 32], strides = [1, 1]} : vector<8x128xf32> to vector<8x32xf32>
    %401 = vector.extract_strided_slice %398 {offsets = [0, 32], sizes = [8, 32], strides = [1, 1]} : vector<8x128xf32> to vector<8x32xf32>
    %402 = vector.extract_strided_slice %399 {offsets = [0, 64], sizes = [8, 32], strides = [1, 1]} : vector<8x128xf32> to vector<8x32xf32>
    %403 = vector.extract_strided_slice %398 {offsets = [0, 96], sizes = [8, 32], strides = [1, 1]} : vector<8x128xf32> to vector<8x32xf32>
    %404 = arith.mulf %401, %382 : vector<8x32xf32>
    %405 = arith.mulf %400, %402 : vector<8x32xf32>
    %406 = arith.addf %404, %405 : vector<8x32xf32>
    %407 = math.tanh %406 : vector<8x32xf32>
    %408 = arith.mulf %403, %407 : vector<8x32xf32>
    %409 = arith.index_cast %389 : i32 to index
    %c0_112 = arith.constant 0 : index
    %410 = vector.load %arg12[%409, %c0_112] : memref<80x32xf32, #tpu.memory_space<vmem>>, vector<8x32xf32>
    tpu.vector_store %arg12[%409, %c0_112], %408 {strides = array<i32>} : memref<80x32xf32, #tpu.memory_space<vmem>>, vector<8x32xf32>,
    %c7_i32_113 = arith.constant 7 : i32
    %c9_i32_114 = arith.constant 9 : i32
    %411 = arith.subi %c9_i32_114, %c7_i32_113 : i32
    %c8_i32_115 = arith.constant 8 : i32
    %412 = arith.muli %411, %c8_i32_115 : i32
    %413 = tpu.assume_multiple %412, 8 : i32
    %414 = arith.index_cast %413 : i32 to index
    %c0_116 = arith.constant 0 : index
    %415 = vector.load %arg10[%414, %c0_116] : memref<80x128xf32, #tpu.memory_space<vmem>>, vector<8x128xf32>
    %cst_117 = arith.constant dense<0.000000e+00> : vector<8x128xf32>
    %416 = tpu.matmul %408, %11, %cst_117 {dimension_numbers = #tpu.dot_dimension_numbers<[1], [0], [0], [1], [0, 0, 1, 1], [], []>} : vector<8x32xf32>, vector<32x128xf32>, vector<8x128xf32> -> vector<8x128xf32>
    %417 = arith.addf %415, %416 : vector<8x128xf32>
    %418 = arith.negf %417 : vector<8x128xf32>
    %419 = math.exp %418 : vector<8x128xf32>
    %cst_118 = arith.constant 1.000000e+00 : f32
    %420 = vector.broadcast %cst_118 : f32 to vector<8x128xf32>
    %421 = arith.addf %420, %419 : vector<8x128xf32>
    %422 = arith.divf %420, %421 : vector<8x128xf32>
    %423 = math.tanh %417 : vector<8x128xf32>
    %424 = vector.extract_strided_slice %422 {offsets = [0, 0], sizes = [8, 32], strides = [1, 1]} : vector<8x128xf32> to vector<8x32xf32>
    %425 = vector.extract_strided_slice %422 {offsets = [0, 32], sizes = [8, 32], strides = [1, 1]} : vector<8x128xf32> to vector<8x32xf32>
    %426 = vector.extract_strided_slice %423 {offsets = [0, 64], sizes = [8, 32], strides = [1, 1]} : vector<8x128xf32> to vector<8x32xf32>
    %427 = vector.extract_strided_slice %422 {offsets = [0, 96], sizes = [8, 32], strides = [1, 1]} : vector<8x128xf32> to vector<8x32xf32>
    %428 = arith.mulf %425, %406 : vector<8x32xf32>
    %429 = arith.mulf %424, %426 : vector<8x32xf32>
    %430 = arith.addf %428, %429 : vector<8x32xf32>
    %431 = math.tanh %430 : vector<8x32xf32>
    %432 = arith.mulf %427, %431 : vector<8x32xf32>
    %433 = arith.index_cast %413 : i32 to index
    %c0_119 = arith.constant 0 : index
    %434 = vector.load %arg12[%433, %c0_119] : memref<80x32xf32, #tpu.memory_space<vmem>>, vector<8x32xf32>
    tpu.vector_store %arg12[%433, %c0_119], %432 {strides = array<i32>} : memref<80x32xf32, #tpu.memory_space<vmem>>, vector<8x32xf32>,
    %c8_i32_120 = arith.constant 8 : i32
    %c9_i32_121 = arith.constant 9 : i32
    %435 = arith.subi %c9_i32_121, %c8_i32_120 : i32
    %c8_i32_122 = arith.constant 8 : i32
    %436 = arith.muli %435, %c8_i32_122 : i32
    %437 = tpu.assume_multiple %436, 8 : i32
    %438 = arith.index_cast %437 : i32 to index
    %c0_123 = arith.constant 0 : index
    %439 = vector.load %arg10[%438, %c0_123] : memref<80x128xf32, #tpu.memory_space<vmem>>, vector<8x128xf32>
    %cst_124 = arith.constant dense<0.000000e+00> : vector<8x128xf32>
    %440 = tpu.matmul %432, %11, %cst_124 {dimension_numbers = #tpu.dot_dimension_numbers<[1], [0], [0], [1], [0, 0, 1, 1], [], []>} : vector<8x32xf32>, vector<32x128xf32>, vector<8x128xf32> -> vector<8x128xf32>
    %441 = arith.addf %439, %440 : vector<8x128xf32>
    %442 = arith.negf %441 : vector<8x128xf32>
    %443 = math.exp %442 : vector<8x128xf32>
    %cst_125 = arith.constant 1.000000e+00 : f32
    %444 = vector.broadcast %cst_125 : f32 to vector<8x128xf32>
    %445 = arith.addf %444, %443 : vector<8x128xf32>
    %446 = arith.divf %444, %445 : vector<8x128xf32>
    %447 = math.tanh %441 : vector<8x128xf32>
    %448 = vector.extract_strided_slice %446 {offsets = [0, 0], sizes = [8, 32], strides = [1, 1]} : vector<8x128xf32> to vector<8x32xf32>
    %449 = vector.extract_strided_slice %446 {offsets = [0, 32], sizes = [8, 32], strides = [1, 1]} : vector<8x128xf32> to vector<8x32xf32>
    %450 = vector.extract_strided_slice %447 {offsets = [0, 64], sizes = [8, 32], strides = [1, 1]} : vector<8x128xf32> to vector<8x32xf32>
    %451 = vector.extract_strided_slice %446 {offsets = [0, 96], sizes = [8, 32], strides = [1, 1]} : vector<8x128xf32> to vector<8x32xf32>
    %452 = arith.mulf %449, %430 : vector<8x32xf32>
    %453 = arith.mulf %448, %450 : vector<8x32xf32>
    %454 = arith.addf %452, %453 : vector<8x32xf32>
    %455 = math.tanh %454 : vector<8x32xf32>
    %456 = arith.mulf %451, %455 : vector<8x32xf32>
    %457 = arith.index_cast %437 : i32 to index
    %c0_126 = arith.constant 0 : index
    %458 = vector.load %arg12[%457, %c0_126] : memref<80x32xf32, #tpu.memory_space<vmem>>, vector<8x32xf32>
    tpu.vector_store %arg12[%457, %c0_126], %456 {strides = array<i32>} : memref<80x32xf32, #tpu.memory_space<vmem>>, vector<8x32xf32>,
    %c9_i32_127 = arith.constant 9 : i32
    %c9_i32_128 = arith.constant 9 : i32
    %459 = arith.subi %c9_i32_128, %c9_i32_127 : i32
    %c8_i32_129 = arith.constant 8 : i32
    %460 = arith.muli %459, %c8_i32_129 : i32
    %461 = tpu.assume_multiple %460, 8 : i32
    %462 = arith.index_cast %461 : i32 to index
    %c0_130 = arith.constant 0 : index
    %463 = vector.load %arg10[%462, %c0_130] : memref<80x128xf32, #tpu.memory_space<vmem>>, vector<8x128xf32>
    %cst_131 = arith.constant dense<0.000000e+00> : vector<8x128xf32>
    %464 = tpu.matmul %456, %11, %cst_131 {dimension_numbers = #tpu.dot_dimension_numbers<[1], [0], [0], [1], [0, 0, 1, 1], [], []>} : vector<8x32xf32>, vector<32x128xf32>, vector<8x128xf32> -> vector<8x128xf32>
    %465 = arith.addf %463, %464 : vector<8x128xf32>
    %466 = arith.negf %465 : vector<8x128xf32>
    %467 = math.exp %466 : vector<8x128xf32>
    %cst_132 = arith.constant 1.000000e+00 : f32
    %468 = vector.broadcast %cst_132 : f32 to vector<8x128xf32>
    %469 = arith.addf %468, %467 : vector<8x128xf32>
    %470 = arith.divf %468, %469 : vector<8x128xf32>
    %471 = math.tanh %465 : vector<8x128xf32>
    %472 = vector.extract_strided_slice %470 {offsets = [0, 0], sizes = [8, 32], strides = [1, 1]} : vector<8x128xf32> to vector<8x32xf32>
    %473 = vector.extract_strided_slice %470 {offsets = [0, 32], sizes = [8, 32], strides = [1, 1]} : vector<8x128xf32> to vector<8x32xf32>
    %474 = vector.extract_strided_slice %471 {offsets = [0, 64], sizes = [8, 32], strides = [1, 1]} : vector<8x128xf32> to vector<8x32xf32>
    %475 = vector.extract_strided_slice %470 {offsets = [0, 96], sizes = [8, 32], strides = [1, 1]} : vector<8x128xf32> to vector<8x32xf32>
    %476 = arith.mulf %473, %454 : vector<8x32xf32>
    %477 = arith.mulf %472, %474 : vector<8x32xf32>
    %478 = arith.addf %476, %477 : vector<8x32xf32>
    %479 = math.tanh %478 : vector<8x32xf32>
    %480 = arith.mulf %475, %479 : vector<8x32xf32>
    %481 = arith.index_cast %461 : i32 to index
    %c0_133 = arith.constant 0 : index
    %482 = vector.load %arg12[%481, %c0_133] : memref<80x32xf32, #tpu.memory_space<vmem>>, vector<8x32xf32>
    tpu.vector_store %arg12[%481, %c0_133], %480 {strides = array<i32>} : memref<80x32xf32, #tpu.memory_space<vmem>>, vector<8x32xf32>,
    %c10_i32_134 = arith.constant 10 : i32
    %c0_135 = arith.constant 0 : index
    %c0_136 = arith.constant 0 : index
    %483 = vector.load %arg11[%c0_135, %c0_136] : memref<80x32xf32, #tpu.memory_space<vmem>>, vector<80x32xf32>
    %c0_137 = arith.constant 0 : index
    %c0_138 = arith.constant 0 : index
    %484 = vector.load %arg5[%c0_137, %c0_138] : memref<32x8xf32, #tpu.memory_space<vmem>>, vector<32x8xf32>
    %cst_139 = arith.constant dense<0.000000e+00> : vector<80x8xf32>
    %485 = tpu.matmul %483, %484, %cst_139 {dimension_numbers = #tpu.dot_dimension_numbers<[1], [0], [0], [1], [0, 0, 1, 1], [], []>} : vector<80x32xf32>, vector<32x8xf32>, vector<80x8xf32> -> vector<80x8xf32>
    %c0_140 = arith.constant 0 : index
    %c0_141 = arith.constant 0 : index
    %486 = vector.load %arg12[%c0_140, %c0_141] : memref<80x32xf32, #tpu.memory_space<vmem>>, vector<80x32xf32>
    %c0_142 = arith.constant 0 : index
    %c0_143 = arith.constant 0 : index
    %487 = vector.load %arg6[%c0_142, %c0_143] : memref<32x8xf32, #tpu.memory_space<vmem>>, vector<32x8xf32>
    %cst_144 = arith.constant dense<0.000000e+00> : vector<80x8xf32>
    %488 = tpu.matmul %486, %487, %cst_144 {dimension_numbers = #tpu.dot_dimension_numbers<[1], [0], [0], [1], [0, 0, 1, 1], [], []>} : vector<80x32xf32>, vector<32x8xf32>, vector<80x8xf32> -> vector<80x8xf32>
    %489 = arith.addf %485, %488 : vector<80x8xf32>
    %c0_145 = arith.constant 0 : index
    %c0_146 = arith.constant 0 : index
    %490 = vector.load %arg7[%c0_145, %c0_146] : memref<1x8xf32, #tpu.memory_space<vmem>>, vector<1x8xf32>
    %491 = vector.broadcast %490 : vector<1x8xf32> to vector<80x8xf32>
    %492 = arith.addf %489, %491 : vector<80x8xf32>
    %c0_147 = arith.constant 0 : index
    %c0_148 = arith.constant 0 : index
    %493 = vector.load %arg8[%c0_147, %c0_148] : memref<80x8xf32, #tpu.memory_space<vmem>>, vector<80x8xf32>
    tpu.vector_store %arg8[%c0_147, %c0_148], %492 {strides = array<i32>} : memref<80x8xf32, #tpu.memory_space<vmem>>, vector<80x8xf32>,
    return
  }
}

</mosaic_0001>

<bundles_post_ra>
// kernel: bilstm_model.1
= control target key start
LH: loop header
LB: loop body
LE: loop exit
PB: predicated region body
PF: predicated region fallthrough
CT: control target
= control target key end

     0   :  { %vm53_vm0 = vcmask 261120   ;;  %v2022_v14 = vmov 0.0   ;;  %s2023_s12 = smov 64   ;;  %s2585_s1 = inlined_call_operand.vmem [shape: f32[32,256], index: 1, kind: input, shape index: {}]   ;;  %s2586_s0 = inlined_call_operand.vmem [shape: f32[80,32], index: 0, kind: input, shape index: {}]   ;;  %s2587_s2 = inlined_call_operand.vmem [shape: f32[32,128], index: 2, kind: input, shape index: {}]   ;;  %s2588_s4 = inlined_call_operand.vmem [shape: f32[1,256], index: 4, kind: input, shape index: {}]   ;;  %s2589_s5 = inlined_call_operand.vmem [shape: f32[32,8], index: 5, kind: input, shape index: {}]   ;;  %s2590_s3 = inlined_call_operand.vmem [shape: f32[32,128], index: 3, kind: input, shape index: {}]   ;;  %s2591_s6 = inlined_call_operand.vmem [shape: f32[32,8], index: 6, kind: input, shape index: {}]   ;;  %s2592_s7 = inlined_call_operand.vmem [shape: f32[1,8], index: 7, kind: input, shape index: {}]   ;;  %s2593_s8 = inlined_call_operand.vmem [shape: f32[80,8], index: 8, kind: output, shape index: {}]  }
   0x1   :  { %v45_v0 = vld [vmem:[%s2585_s1 + $0x30] sm:$0xff]  ;;  %v43_v1 = vld [vmem:[%s2585_s1 + $0x20] sm:$0xff]  ;;  %v2085_v4 = vld [vmem:[%s2586_s0 + $0x28] sm:$0xff] }
   0x2   :  { %1850 = vmatpush.msra.mxu2 %v45_v0  ;;  %96 = vmatpush.msra.mxu0 %v45_v0  ;;  %v41_v2 = vld [vmem:[%s2585_s1 + $0x10] sm:$0xff]  ;;  %v39_v3 = vld [vmem:[%s2585_s1] sm:$0xff]  ;;  %v2090_v5 = vld [vmem:[%s2587_s2 + $0x18] sm:$0xff] }
   0x3   :  { %v2097_v6 = vld [vmem:[%s2587_s2 + $0x10] sm:$0xff]  ;;  %v2103_v7 = vld [vmem:[%s2587_s2 + $0x8] sm:$0xff]  ;;  %v2109_v8 = vld [vmem:[%s2587_s2] sm:$0xff] }
   0x4   :  { %1851 = vmatpush.msra.mxu2 %v43_v1  ;;  %97 = vmatpush.msra.mxu0 %v43_v1  ;;  %v2114_v9 = vld [vmem:[%s2586_s0 + $0x30] sm:$0xff]  ;;  %v2123_v10 = vld [vmem:[%s2586_s0] sm:$0xff]  ;;  %v2132_v11 = vld [vmem:[%s2586_s0 + $0x38] sm:$0xff] }
   0x5   :  { %v2141_v12 = vld [vmem:[%s2586_s0 + $0x40] sm:$0xff]  ;;  %v2148_v13 = vld [vmem:[%s2586_s0 + $0x48] sm:$0xff]  ;;  %v46_v46 = vld [vmem:[%s2585_s1 + $0x38] sm:$0xff] }
   0x6   :  { %1852 = vmatpush.msra.mxu2 %v41_v2  ;;  %98 = vmatpush.msra.mxu0 %v41_v2  ;;  %v2168_v19 = vld [vmem:[%s2588_s4] sm:$0x3]  ;;  %s2024_s4 = smov 32   ;;  %v44_v47 = vld [vmem:[%s2585_s1 + $0x28] sm:$0xff]  ;;  %v42_v49 = vld [vmem:[%s2585_s1 + $0x18] sm:$0xff] }
   0x7   :  { %v2173_v22 = vperm.slane %v2168_v19, 0  ;;  %1854 = vmatpush.msra.mxu3 %v46_v46  ;;  %143 = vmatpush.msra.mxu1 %v46_v46  ;;  %v30_v48 = vld [vmem:[%s2586_s0 + $0x8] sm:$0xff]  ;;  %v31_v51 = vld [vmem:[%s2586_s0 + $0x10] sm:$0xff]  ;;  %v32_v52 = vld [vmem:[%s2586_s0 + $0x18] sm:$0xff] }
   0x8   :  { %1853 = vmatpush.msra.mxu2 %v39_v3  ;;  %99 = vmatpush.msra.mxu0 %v39_v3  ;;  %v40_v50 = vld [vmem:[%s2585_s1 + $0x8] sm:$0xff]  ;;  %v33_v55 = vld [vmem:[%s2586_s0 + $0x20] sm:$0xff]  ;;  %v1574_v56 = vld [vmem:[%s2589_s5 + $0x18] sm:$0xff] }
   0x9   :  { %1777 = vmatmul.msk.f32.vlgmr.msra.gmra.mxu2 %vm53_vm0, %v2085_v4  ;;  %1772 = vmatmul.msk.f32.vlgmr.msra.gmra.mxu0 %vm53_vm0, %v2123_v10  ;;  %v1573_v57 = vld [vmem:[%s2589_s5 + $0x10] sm:$0xff]  ;;  %v1572_v58 = vld [vmem:[%s2589_s5 + $0x8] sm:$0xff]  ;;  %v1571_v59 = vld [vmem:[%s2589_s5] sm:$0xff] }
   0xa   :  { %222 = vmatpush.msrb.mxu2 %v2090_v5  ;;  %1855 = vmatpush.msra.mxu3 %v44_v47 }
   0xb   :  { %144 = vmatpush.msra.mxu1 %v44_v47 }
   0xc   :  { %223 = vmatpush.msrb.mxu2 %v2097_v6  ;;  %1856 = vmatpush.msra.mxu3 %v42_v49 }
   0xd   :  { %145 = vmatpush.msra.mxu1 %v42_v49 }
   0xe   :  { %224 = vmatpush.msrb.mxu2 %v2103_v7  ;;  %1857 = vmatpush.msra.mxu3 %v40_v50 }
   0xf   :  { %146 = vmatpush.msra.mxu1 %v40_v50  ;;  %1787 = vmatmul.msk.f32.vlgmr.msra.gmra.mxu3 %vm53_vm0, %v2085_v4 }
  0x10   :  { %225 = vmatpush.msrb.mxu2 %v2109_v8  ;;  %1782 = vmatmul.msk.f32.vlgmr.msra.gmra.mxu1 %vm53_vm0, %v2123_v10 }
  0x11   :  { %1778 = vmatmul.msk.f32.gmra.mxu2 %vm53_vm0, %v2114_v9  ;;  %1773 = vmatmul.msk.f32.gmra.mxu0 %vm53_vm0, %v30_v48 }
  0x12   :  { %357 = vmatpush.msra.mxu2 %v2090_v5  ;;  %289 = vmatpush.msrb.mxu3 %v2090_v5 }
  0x13   :  { %1708 = vmatpush.msrb.mxu1 %v1574_v56 }
  0x14   :  { %358 = vmatpush.msra.mxu2 %v2097_v6  ;;  %290 = vmatpush.msrb.mxu3 %v2097_v6 }
  0x15   :  { %1709 = vmatpush.msrb.mxu1 %v1573_v57 }
  0x16   :  { %359 = vmatpush.msra.mxu2 %v2103_v7  ;;  %291 = vmatpush.msrb.mxu3 %v2103_v7 }
  0x17   :  { %1788 = vmatmul.msk.f32.gmra.mxu3 %vm53_vm0, %v2114_v9  ;;  %1710 = vmatpush.msrb.mxu1 %v1572_v58 }
  0x18   :  { %360 = vmatpush.msra.mxu2 %v2109_v8  ;;  %292 = vmatpush.msrb.mxu3 %v2109_v8 }
  0x19   :  { %1779 = vmatmul.msk.f32.gmra.mxu2 %vm53_vm0, %v2132_v11  ;;  %1774 = vmatmul.msk.f32.gmra.mxu0 %vm53_vm0, %v31_v51 }
  0x1a   :  { %1783 = vmatmul.msk.f32.gmra.mxu1 %vm53_vm0, %v30_v48  ;;  %425 = vmatpush.msra.mxu3 %v2090_v5 }
  0x1b   :  { %1711 = vmatpush.msrb.mxu1 %v1571_v59 }
  0x1c   :  { %426 = vmatpush.msra.mxu3 %v2097_v6 }
  0x1e   :  { %427 = vmatpush.msra.mxu3 %v2103_v7 }
  0x1f   :  { %1789 = vmatmul.msk.f32.gmra.mxu3 %vm53_vm0, %v2132_v11 }
  0x20   :  { %428 = vmatpush.msra.mxu3 %v2109_v8 }
  0x21   :  { %1780 = vmatmul.msk.f32.gmra.mxu2 %vm53_vm0, %v2141_v12  ;;  %1775 = vmatmul.msk.f32.gmra.mxu0 %vm53_vm0, %v32_v52 }
  0x22   :  { %1784 = vmatmul.msk.f32.gmra.mxu1 %vm53_vm0, %v31_v51 }
  0x27   :  { %1790 = vmatmul.msk.f32.gmra.mxu3 %vm53_vm0, %v2141_v12 }
  0x29   :  { %1781 = vmatmul.msk.f32.gmra.mxu2 %vm53_vm0, %v2148_v13  ;;  %1776 = vmatmul.msk.f32.gmra.mxu0 %vm53_vm0, %v33_v55 }
  0x2a   :  { %1785 = vmatmul.msk.f32.gmra.mxu1 %vm53_vm0, %v32_v52 }
  0x2f   :  { %1791 = vmatmul.msk.f32.gmra.mxu3 %vm53_vm0, %v2148_v13 }
  0x31   :  { %226 = vmatmul.f32.vlgmr.msrb.gmra.mxu2 %v2022_v14 }
  0x32   :  { %493 = vmatpush.msrb.mxu2 %v2090_v5  ;;  %1786 = vmatmul.msk.f32.gmra.mxu1 %vm53_vm0, %v33_v55 }
  0x34   :  { %494 = vmatpush.msrb.mxu2 %v2097_v6 }
  0x36   :  { %495 = vmatpush.msrb.mxu2 %v2103_v7 }
  0x38   :  { %496 = vmatpush.msrb.mxu2 %v2109_v8 }
  0x86   :  { %v101_v21 = vpop.f32.mrf.mxu0 }
  0x87   :  { %v102_v23 = vadd.f32 %v101_v21, %v2173_v22 }
  0x8c   :  { %v2157_v15 = vpop.f32.mrf.mxu2 }
  0x8e   :  { %v104_v3 = vpop.f32.mrf.mxu0 }
  0x8f   :  { %v105_v4 = vadd.f32 %v104_v3, %v2173_v22 }
  0x92   :  { %v2254_v62 = vpop.f32.mrf.mxu3 }
  0x94   :  { %v2159_v16 = vpop.f32.mrf.mxu2 }
  0x9a   :  { %v2256_v63 = vpop.f32.mrf.mxu3 }
  0x9c   :  { %v2161_v17 = vpop.f32.mrf.mxu2 }
  0xa2   :  { %v2258_v0 = vpop.f32.mrf.mxu3 }
  0xa4   :  { %v2163_v18 = vpop.f32.mrf.mxu2 }
  0xaa   :  { %v2260_v1 = vpop.f32.mrf.mxu3 }
  0xac   :  { %v2170_v20 = vpop.f32.mrf.mxu2 }
  0xb2   :  { %v2262_v2 = vpop.f32.mrf.mxu3 }
  0xb4   :  { %v227_v24 = vpop.f32.mrf.mxu2 }
  0xb5   :  { %v230_v25 = vadd.f32 %v227_v24, %v102_v23 }
  0xb7   :  { %1862 = vtanh.f32 %v230_v25  ;;  %v1792_v27 = vmul.f32 -1.442695, %v230_v25 }
  0xb9   :  { %1864 = vpow2.f32 %v1792_v27 }
  0xbd   :  { %v1863_v26 = vpop.eup %1862 }
  0xbe   :  { %253 = vrot.lane.b32.xlu0 %v1863_v26, %s2023_s12 }
  0xbf   :  { %v1865_v28 = vpop.eup %1864 }
  0xc0   :  { %v234_v29 = vadd.f32 1.0, %v1865_v28 }
  0xc2   :  { %1866 = vrcp.f32 %v234_v29  ;;  %v246_v35 = vand.u32 2147483648, %v234_v29  ;;  %vm240_vm2 = vweird.f32 %v234_v29  ;;  %v244_v36 = vand.u32 2147483647, %v234_v29 }
  0xc4   :  { %v247_v38 = vor.u32 1.1754944e-38, %v246_v35  ;;  %vm245_vm4 = vcmp.eq.f32.partialorder %v244_v36, 8.507059e+37 }
  0xc8   :  { %v1867_v30 = vpop.eup %1866 }
  0xc9   :  { %v236_v31 = vmul.f32 %v1867_v30, %v234_v29  ;;  %vm241_vm1 = vweird.f32 %v1867_v30 }
  0xca   :  { %vm242_vm3 = vmor %vm240_vm2, %vm241_vm1 }
  0xcb   :  { %v237_v32 = vsub.f32 1.0, %v236_v31 }
  0xcd   :  { %v238_v33 = vmul.f32 %v1867_v30, %v237_v32 }
  0xcf   :  { %v239_v34 = vadd.f32 %v1867_v30, %v238_v33 }
  0xd1   :  { %v243_v37 = vsel %vm242_vm3, %v1867_v30, %v239_v34 }
  0xd2   :  { %v248_v40 = vsel %vm245_vm4, %v247_v38, %v243_v37 }
  0xd3   :  { %v251_v42 = vmul.f32 0.0, %v248_v40 }
 0x130   :  { %v254_v39 = vpop.permute.xlu0 %253 }
 0x131   :  { %v256_v41 = vmul.f32 %v254_v39, %v248_v40 }
 0x133   :  { %258 = vrot.lane.b32.xlu0 %v256_v41, %s2024_s4 }
 0x1a5   :  { %v259_v43 = vpop.permute.xlu0 %258 }
 0x1a6   :  { %v2178_v44 = vadd.f32 %v259_v43, %v251_v42  ;;  %v107_v43 = vpop.f32.mrf.mxu0 }
 0x1a8   :  { %1868 = vtanh.f32 %v2178_v44 }
 0x1ae   :  { %v1869_v45 = vpop.eup %1868 }
 0x1af   :  { %264 = vrot.lane.b32.xlu1 %v1869_v45, %s2023_s12 }
 0x221   :  { %v265_v53 = vpop.permute.xlu1 %264 }
 0x222   :  { %v267_v54 = vmul.f32 %v265_v53, %v248_v40 }
 0x224   :  { %269 = vrot.lane.b32.xlu1 %v267_v54, %s2024_s4 }
 0x296   :  { %v270_v60 = vpop.permute.xlu1 %269 }
 0x297   :  { %272 = vst.msk [vmem:[#allocation4] sm:$0xff] %vm53_vm0, %v270_v60  ;;  %1793 = vmatmul.msk.f32.vlgmr.msrb.gmra.mxu3 %vm53_vm0, %v270_v60 }
 0x298   :  { %561 = vmatpush.msrb.mxu3 %v2090_v5 }
 0x29a   :  { %562 = vmatpush.msrb.mxu3 %v2097_v6 }
 0x29c   :  { %563 = vmatpush.msrb.mxu3 %v2103_v7 }
 0x29e   :  { %v1561_v61 = vld [vmem:[#allocation4] sm:$0xff]  ;;  %564 = vmatpush.msrb.mxu3 %v2109_v8 }
 0x29f   :  { %1840 = vmatmul.msk.f32.vlgmr.msrb.gmra.mxu1 %vm53_vm0, %v1561_v61 }
 0x31a   :  { %v294_v9 = vpop.f32.mrf.mxu3 }
 0x31b   :  { %v297_v10 = vadd.f32 %v294_v9, %v105_v4 }
 0x31d   :  { %1870 = vtanh.f32 %v297_v10  ;;  %v1794_v12 = vmul.f32 -1.442695, %v297_v10 }
 0x31f   :  { %1872 = vpow2.f32 %v1794_v12 }
 0x323   :  { %v1871_v11 = vpop.eup %1870 }
 0x324   :  { %320 = vrot.lane.b32.xlu2 %v1871_v11, %s2023_s12 }
 0x325   :  { %v1873_v13 = vpop.eup %1872 }
 0x326   :  { %v301_v21 = vadd.f32 1.0, %v1873_v13 }
 0x328   :  { %1874 = vrcp.f32 %v301_v21  ;;  %v313_v28 = vand.u32 2147483648, %v301_v21  ;;  %vm307_vm6 = vweird.f32 %v301_v21  ;;  %v311_v29 = vand.u32 2147483647, %v301_v21 }
 0x32a   :  { %v314_v31 = vor.u32 1.1754944e-38, %v313_v28  ;;  %vm312_vm8 = vcmp.eq.f32.partialorder %v311_v29, 8.507059e+37 }
 0x32e   :  { %v1875_v23 = vpop.eup %1874 }
 0x32f   :  { %v303_v24 = vmul.f32 %v1875_v23, %v301_v21  ;;  %vm308_vm5 = vweird.f32 %v1875_v23 }
 0x330   :  { %vm309_vm7 = vmor %vm307_vm6, %vm308_vm5 }
 0x331   :  { %v304_v25 = vsub.f32 1.0, %v303_v24  ;;  %v110_v24 = vpop.f32.mrf.mxu0 }
 0x333   :  { %v305_v26 = vmul.f32 %v1875_v23, %v304_v25  ;;  %v111_v25 = vadd.f32 %v110_v24, %v2173_v22 }
 0x335   :  { %v306_v27 = vadd.f32 %v1875_v23, %v305_v26 }
 0x337   :  { %v310_v30 = vsel %vm309_vm7, %v1875_v23, %v306_v27 }
 0x338   :  { %v315_v33 = vsel %vm312_vm8, %v314_v31, %v310_v30 }
 0x339   :  { %v318_v35 = vmul.f32 %v315_v33, %v2178_v44  ;;  %v108_v44 = vadd.f32 %v107_v43, %v2173_v22 }
 0x37e   :  { %v321_v32 = vpop.permute.xlu2 %320 }
 0x37f   :  { %v323_v34 = vmul.f32 %v321_v32, %v315_v33 }
 0x381   :  { %325 = vrot.lane.b32.xlu2 %v323_v34, %s2024_s4 }
 0x3db   :  { %v326_v36 = vpop.permute.xlu2 %325 }
 0x3dc   :  { %v328_v37 = vadd.f32 %v326_v36, %v318_v35 }
 0x3de   :  { %1876 = vtanh.f32 %v328_v37 }
 0x3e4   :  { %v1877_v38 = vpop.eup %1876 }
 0x3e5   :  { %331 = vrot.lane.b32.xlu0 %v1877_v38, %s2023_s12 }
 0x457   :  { %v332_v39 = vpop.permute.xlu0 %331 }
 0x458   :  { %v334_v40 = vmul.f32 %v332_v39, %v315_v33 }
 0x45a   :  { %336 = vrot.lane.b32.xlu1 %v334_v40, %s2024_s4 }
 0x4cc   :  { %v337_v41 = vpop.permute.xlu1 %336 }
 0x4cd   :  { %340 = vst.msk [vmem:[#allocation4 + $0x8] sm:$0xff] %vm53_vm0, %v337_v41  ;;  %1795 = vmatmul.msk.f32.vlgmr.msra.gmra.mxu2 %vm53_vm0, %v337_v41 }
 0x4ce   :  { %629 = vmatpush.msra.mxu2 %v2090_v5 }
 0x4d0   :  { %630 = vmatpush.msra.mxu2 %v2097_v6 }
 0x4d2   :  { %631 = vmatpush.msra.mxu2 %v2103_v7 }
 0x4d4   :  { %v1562_v42 = vld [vmem:[#allocation4 + $0x8] sm:$0xff]  ;;  %632 = vmatpush.msra.mxu2 %v2109_v8 }
 0x4d5   :  { %1841 = vmatmul.msk.f32.gmra.mxu1 %vm53_vm0, %v1562_v42 }
 0x550   :  { %v362_v45 = vpop.f32.mrf.mxu2 }
 0x551   :  { %v365_v46 = vadd.f32 %v362_v45, %v108_v44 }
 0x553   :  { %1878 = vtanh.f32 %v365_v46  ;;  %v1796_v48 = vmul.f32 -1.442695, %v365_v46 }
 0x555   :  { %1880 = vpow2.f32 %v1796_v48 }
 0x559   :  { %v1879_v47 = vpop.eup %1878 }
 0x55a   :  { %388 = vrot.lane.b32.xlu2 %v1879_v47, %s2023_s12 }
 0x55b   :  { %v1881_v49 = vpop.eup %1880 }
 0x55c   :  { %v369_v50 = vadd.f32 1.0, %v1881_v49 }
 0x55e   :  { %1882 = vrcp.f32 %v369_v50  ;;  %v381_v56 = vand.u32 2147483648, %v369_v50  ;;  %vm375_vm10 = vweird.f32 %v369_v50  ;;  %v379_v57 = vand.u32 2147483647, %v369_v50 }
 0x560   :  { %v382_v59 = vor.u32 1.1754944e-38, %v381_v56  ;;  %vm380_vm12 = vcmp.eq.f32.partialorder %v379_v57, 8.507059e+37 }
 0x564   :  { %v1883_v51 = vpop.eup %1882 }
 0x565   :  { %v371_v52 = vmul.f32 %v1883_v51, %v369_v50  ;;  %vm376_vm9 = vweird.f32 %v1883_v51 }
 0x566   :  { %vm377_vm11 = vmor %vm375_vm10, %vm376_vm9 }
 0x567   :  { %v372_v53 = vsub.f32 1.0, %v371_v52  ;;  %v113_v52 = vpop.f32.mrf.mxu0 }
 0x569   :  { %v373_v54 = vmul.f32 %v1883_v51, %v372_v53  ;;  %v114_v53 = vadd.f32 %v113_v52, %v2173_v22 }
 0x56b   :  { %v374_v55 = vadd.f32 %v1883_v51, %v373_v54 }
 0x56d   :  { %v378_v58 = vsel %vm377_vm11, %v1883_v51, %v374_v55 }
 0x56e   :  { %v383_v61 = vsel %vm380_vm12, %v382_v59, %v378_v58 }
 0x56f   :  { %v386_v4 = vmul.f32 %v383_v61, %v328_v37 }
 0x5b4   :  { %v389_v60 = vpop.permute.xlu2 %388 }
 0x5b5   :  { %v391_v3 = vmul.f32 %v389_v60, %v383_v61 }
 0x5b7   :  { %393 = vrot.lane.b32.xlu0 %v391_v3, %s2024_s4 }
 0x629   :  { %v394_v9 = vpop.permute.xlu0 %393 }
 0x62a   :  { %v396_v10 = vadd.f32 %v394_v9, %v386_v4 }
 0x62c   :  { %1884 = vtanh.f32 %v396_v10 }
 0x632   :  { %v1885_v11 = vpop.eup %1884 }
 0x633   :  { %399 = vrot.lane.b32.xlu1 %v1885_v11, %s2023_s12 }
 0x6a5   :  { %v400_v12 = vpop.permute.xlu1 %399 }
 0x6a6   :  { %v402_v13 = vmul.f32 %v400_v12, %v383_v61 }
 0x6a8   :  { %404 = vrot.lane.b32.xlu2 %v402_v13, %s2024_s4 }
 0x702   :  { %v405_v21 = vpop.permute.xlu2 %404 }
 0x703   :  { %408 = vst.msk [vmem:[#allocation4 + $0x10] sm:$0xff] %vm53_vm0, %v405_v21  ;;  %1797 = vmatmul.msk.f32.vlgmr.msra.gmra.mxu3 %vm53_vm0, %v405_v21 }
 0x704   :  { %697 = vmatpush.msra.mxu3 %v2090_v5 }
 0x706   :  { %698 = vmatpush.msra.mxu3 %v2097_v6 }
 0x708   :  { %699 = vmatpush.msra.mxu3 %v2103_v7 }
 0x70a   :  { %v1563_v23 = vld [vmem:[#allocation4 + $0x10] sm:$0xff]  ;;  %700 = vmatpush.msra.mxu3 %v2109_v8 }
 0x70b   :  { %1842 = vmatmul.msk.f32.gmra.mxu1 %vm53_vm0, %v1563_v23 }
 0x786   :  { %v430_v26 = vpop.f32.mrf.mxu3 }
 0x787   :  { %v433_v27 = vadd.f32 %v430_v26, %v111_v25 }
 0x789   :  { %1886 = vtanh.f32 %v433_v27  ;;  %v1798_v29 = vmul.f32 -1.442695, %v433_v27 }
 0x78b   :  { %1888 = vpow2.f32 %v1798_v29 }
 0x78f   :  { %v1887_v28 = vpop.eup %1886 }
 0x790   :  { %456 = vrot.lane.b32.xlu0 %v1887_v28, %s2023_s12 }
 0x791   :  { %v1889_v30 = vpop.eup %1888 }
 0x792   :  { %v437_v31 = vadd.f32 1.0, %v1889_v30 }
 0x794   :  { %1890 = vrcp.f32 %v437_v31  ;;  %v449_v37 = vand.u32 2147483648, %v437_v31  ;;  %vm443_vm14 = vweird.f32 %v437_v31  ;;  %v447_v38 = vand.u32 2147483647, %v437_v31 }
 0x796   :  { %v450_v40 = vor.u32 1.1754944e-38, %v449_v37  ;;  %vm448_vm1 = vcmp.eq.f32.partialorder %v447_v38, 8.507059e+37 }
 0x79a   :  { %v1891_v32 = vpop.eup %1890 }
 0x79b   :  { %v439_v33 = vmul.f32 %v1891_v32, %v437_v31  ;;  %vm444_vm13 = vweird.f32 %v1891_v32 }
 0x79c   :  { %vm445_vm15 = vmor %vm443_vm14, %vm444_vm13 }
 0x79d   :  { %v440_v34 = vsub.f32 1.0, %v439_v33  ;;  %v117_v33 = vadd.f32 %v2157_v15, %v2173_v22 }
 0x79f   :  { %v441_v35 = vmul.f32 %v1891_v32, %v440_v34 }
 0x7a1   :  { %v442_v36 = vadd.f32 %v1891_v32, %v441_v35 }
 0x7a3   :  { %v446_v39 = vsel %vm445_vm15, %v1891_v32, %v442_v36 }
 0x7a4   :  { %v451_v42 = vsel %vm448_vm1, %v450_v40, %v446_v39 }
 0x7a5   :  { %v454_v44 = vmul.f32 %v451_v42, %v396_v10 }
 0x802   :  { %v457_v41 = vpop.permute.xlu0 %456 }
 0x803   :  { %v459_v43 = vmul.f32 %v457_v41, %v451_v42 }
 0x805   :  { %461 = vrot.lane.b32.xlu1 %v459_v43, %s2024_s4 }
 0x877   :  { %v462_v45 = vpop.permute.xlu1 %461 }
 0x878   :  { %v464_v46 = vadd.f32 %v462_v45, %v454_v44 }
 0x87a   :  { %1892 = vtanh.f32 %v464_v46 }
 0x880   :  { %v1893_v47 = vpop.eup %1892 }
 0x881   :  { %467 = vrot.lane.b32.xlu2 %v1893_v47, %s2023_s12 }
 0x8db   :  { %v468_v48 = vpop.permute.xlu2 %467 }
 0x8dc   :  { %v470_v49 = vmul.f32 %v468_v48, %v451_v42 }
 0x8de   :  { %472 = vrot.lane.b32.xlu0 %v470_v49, %s2024_s4 }
 0x950   :  { %v473_v50 = vpop.permute.xlu0 %472 }
 0x951   :  { %476 = vst.msk [vmem:[#allocation4 + $0x18] sm:$0xff] %vm53_vm0, %v473_v50  ;;  %1799 = vmatmul.msk.f32.vlgmr.msrb.gmra.mxu2 %vm53_vm0, %v473_v50 }
 0x952   :  { %765 = vmatpush.msrb.mxu2 %v2090_v5 }
 0x954   :  { %766 = vmatpush.msrb.mxu2 %v2097_v6 }
 0x956   :  { %767 = vmatpush.msrb.mxu2 %v2103_v7 }
 0x958   :  { %v1564_v51 = vld [vmem:[#allocation4 + $0x18] sm:$0xff]  ;;  %768 = vmatpush.msrb.mxu2 %v2109_v8 }
 0x959   :  { %1843 = vmatmul.msk.f32.gmra.mxu1 %vm53_vm0, %v1564_v51 }
 0x9d4   :  { %v498_v54 = vpop.f32.mrf.mxu2 }
 0x9d5   :  { %v501_v55 = vadd.f32 %v498_v54, %v114_v53 }
 0x9d7   :  { %1894 = vtanh.f32 %v501_v55  ;;  %v1800_v57 = vmul.f32 -1.442695, %v501_v55  ;;  %v120_v55 = vadd.f32 %v2159_v16, %v2173_v22 }
 0x9d9   :  { %1896 = vpow2.f32 %v1800_v57 }
 0x9dd   :  { %v1895_v56 = vpop.eup %1894 }
 0x9de   :  { %524 = vrot.lane.b32.xlu1 %v1895_v56, %s2023_s12 }
 0x9df   :  { %v1897_v58 = vpop.eup %1896 }
 0x9e0   :  { %v505_v59 = vadd.f32 1.0, %v1897_v58 }
 0x9e2   :  { %1898 = vrcp.f32 %v505_v59  ;;  %v517_v10 = vand.u32 2147483648, %v505_v59  ;;  %vm511_vm3 = vweird.f32 %v505_v59  ;;  %v515_v11 = vand.u32 2147483647, %v505_v59 }
 0x9e4   :  { %v518_v13 = vor.u32 1.1754944e-38, %v517_v10  ;;  %vm516_vm5 = vcmp.eq.f32.partialorder %v515_v11, 8.507059e+37 }
 0x9e8   :  { %v1899_v60 = vpop.eup %1898 }
 0x9e9   :  { %v507_v61 = vmul.f32 %v1899_v60, %v505_v59  ;;  %vm512_vm2 = vweird.f32 %v1899_v60 }
 0x9ea   :  { %vm513_vm4 = vmor %vm511_vm3, %vm512_vm2 }
 0x9eb   :  { %v508_v3 = vsub.f32 1.0, %v507_v61 }
 0x9ed   :  { %v509_v4 = vmul.f32 %v1899_v60, %v508_v3 }
 0x9ef   :  { %v510_v9 = vadd.f32 %v1899_v60, %v509_v4 }
 0x9f1   :  { %v514_v12 = vsel %vm513_vm4, %v1899_v60, %v510_v9 }
 0x9f2   :  { %v519_v23 = vsel %vm516_vm5, %v518_v13, %v514_v12 }
 0x9f3   :  { %v522_v25 = vmul.f32 %v519_v23, %v464_v46 }
 0xa50   :  { %v525_v21 = vpop.permute.xlu1 %524 }
 0xa51   :  { %v527_v24 = vmul.f32 %v525_v21, %v519_v23 }
 0xa53   :  { %529 = vrot.lane.b32.xlu2 %v527_v24, %s2024_s4 }
 0xaad   :  { %v530_v26 = vpop.permute.xlu2 %529 }
 0xaae   :  { %v532_v27 = vadd.f32 %v530_v26, %v522_v25 }
 0xab0   :  { %1900 = vtanh.f32 %v532_v27 }
 0xab6   :  { %v1901_v28 = vpop.eup %1900 }
 0xab7   :  { %535 = vrot.lane.b32.xlu0 %v1901_v28, %s2023_s12 }
 0xb29   :  { %v536_v29 = vpop.permute.xlu0 %535 }
 0xb2a   :  { %v538_v30 = vmul.f32 %v536_v29, %v519_v23 }
 0xb2c   :  { %540 = vrot.lane.b32.xlu1 %v538_v30, %s2024_s4 }
 0xb9e   :  { %v541_v31 = vpop.permute.xlu1 %540 }
 0xb9f   :  { %544 = vst.msk [vmem:[#allocation4 + $0x20] sm:$0xff] %vm53_vm0, %v541_v31  ;;  %1801 = vmatmul.msk.f32.vlgmr.msrb.gmra.mxu3 %vm53_vm0, %v541_v31 }
 0xba0   :  { %833 = vmatpush.msrb.mxu3 %v2090_v5 }
 0xba2   :  { %834 = vmatpush.msrb.mxu3 %v2097_v6 }
 0xba4   :  { %835 = vmatpush.msrb.mxu3 %v2103_v7 }
 0xba6   :  { %v1565_v32 = vld [vmem:[#allocation4 + $0x20] sm:$0xff]  ;;  %836 = vmatpush.msrb.mxu3 %v2109_v8 }
 0xba7   :  { %1844 = vmatmul.msk.f32.gmra.mxu1 %vm53_vm0, %v1565_v32 }
 0xc22   :  { %v566_v34 = vpop.f32.mrf.mxu3 }
 0xc23   :  { %v569_v35 = vadd.f32 %v566_v34, %v117_v33  ;;  %v123_v34 = vadd.f32 %v2161_v17, %v2173_v22 }
 0xc25   :  { %1902 = vtanh.f32 %v569_v35  ;;  %v1802_v37 = vmul.f32 -1.442695, %v569_v35 }
 0xc27   :  { %1904 = vpow2.f32 %v1802_v37 }
 0xc2b   :  { %v1903_v36 = vpop.eup %1902 }
 0xc2c   :  { %592 = vrot.lane.b32.xlu2 %v1903_v36, %s2023_s12 }
 0xc2d   :  { %v1905_v5 = vpop.eup %1904 }
 0xc2e   :  { %v573_v6 = vadd.f32 1.0, %v1905_v5 }
 0xc30   :  { %1906 = vrcp.f32 %v573_v6  ;;  %v585_v41 = vand.u32 2147483648, %v573_v6  ;;  %vm579_vm7 = vweird.f32 %v573_v6  ;;  %v583_v15 = vand.u32 2147483647, %v573_v6 }
 0xc32   :  { %v586_v43 = vor.u32 1.1754944e-38, %v585_v41  ;;  %vm584_vm9 = vcmp.eq.f32.partialorder %v583_v15, 8.507059e+37 }
 0xc36   :  { %v1907_v7 = vpop.eup %1906 }
 0xc37   :  { %v575_v38 = vmul.f32 %v1907_v7, %v573_v6  ;;  %vm580_vm6 = vweird.f32 %v1907_v7 }
 0xc38   :  { %vm581_vm8 = vmor %vm579_vm7, %vm580_vm6 }
 0xc39   :  { %v576_v39 = vsub.f32 1.0, %v575_v38 }
 0xc3b   :  { %v577_v8 = vmul.f32 %v1907_v7, %v576_v39 }
 0xc3d   :  { %v578_v40 = vadd.f32 %v1907_v7, %v577_v8 }
 0xc3f   :  { %v582_v42 = vsel %vm581_vm8, %v1907_v7, %v578_v40 }
 0xc40   :  { %v587_v45 = vsel %vm584_vm9, %v586_v43, %v582_v42 }
 0xc41   :  { %v590_v47 = vmul.f32 %v587_v45, %v532_v27 }
 0xc86   :  { %v593_v44 = vpop.permute.xlu2 %592 }
 0xc87   :  { %v595_v46 = vmul.f32 %v593_v44, %v587_v45 }
 0xc89   :  { %597 = vrot.lane.b32.xlu0 %v595_v46, %s2024_s4 }
 0xcfb   :  { %v598_v48 = vpop.permute.xlu0 %597 }
 0xcfc   :  { %v600_v49 = vadd.f32 %v598_v48, %v590_v47 }
 0xcfe   :  { %1908 = vtanh.f32 %v600_v49 }
 0xd04   :  { %v1909_v50 = vpop.eup %1908 }
 0xd05   :  { %603 = vrot.lane.b32.xlu1 %v1909_v50, %s2023_s12 }
 0xd77   :  { %v604_v51 = vpop.permute.xlu1 %603 }
 0xd78   :  { %v606_v52 = vmul.f32 %v604_v51, %v587_v45 }
 0xd7a   :  { %608 = vrot.lane.b32.xlu2 %v606_v52, %s2024_s4 }
 0xdd4   :  { %v609_v53 = vpop.permute.xlu2 %608 }
 0xdd5   :  { %612 = vst.msk [vmem:[#allocation4 + $0x28] sm:$0xff] %vm53_vm0, %v609_v53  ;;  %1803 = vmatmul.msk.f32.vlgmr.msra.gmra.mxu2 %vm53_vm0, %v609_v53  ;;  %v2343_v53 = vld [vmem:[%s2590_s3 + $0x18] sm:$0xff] }
 0xdd6   :  { %899 = vmatpush.msra.mxu2 %v2343_v53 }
 0xddc   :  { %v1566_v54 = vld [vmem:[#allocation4 + $0x28] sm:$0xff] }
 0xddd   :  { %1845 = vmatmul.msk.f32.gmra.mxu1 %vm53_vm0, %v1566_v54  ;;  %v2348_v54 = vld [vmem:[%s2590_s3 + $0x10] sm:$0xff] }
 0xdde   :  { %900 = vmatpush.msra.mxu2 %v2348_v54 }
 0xe58   :  { %v634_v56 = vpop.f32.mrf.mxu2 }
 0xe59   :  { %v637_v57 = vadd.f32 %v634_v56, %v120_v55  ;;  %v2355_v55 = vld [vmem:[%s2590_s3 + $0x8] sm:$0xff]  ;;  %v2362_v56 = vld [vmem:[%s2590_s3] sm:$0xff] }
 0xe5a   :  { %901 = vmatpush.msra.mxu2 %v2355_v55 }
 0xe5b   :  { %1910 = vtanh.f32 %v637_v57  ;;  %v1804_v59 = vmul.f32 -1.442695, %v637_v57 }
 0xe5c   :  { %902 = vmatpush.msra.mxu2 %v2362_v56 }
 0xe5d   :  { %1912 = vpow2.f32 %v1804_v59  ;;  %v126_v59 = vadd.f32 %v2163_v18, %v2173_v22 }
 0xe61   :  { %v1911_v58 = vpop.eup %1910 }
 0xe62   :  { %660 = vrot.lane.b32.xlu0 %v1911_v58, %s2023_s12 }
 0xe63   :  { %v1913_v60 = vpop.eup %1912 }
 0xe64   :  { %v641_v61 = vadd.f32 1.0, %v1913_v60 }
 0xe66   :  { %1914 = vrcp.f32 %v641_v61  ;;  %v653_v12 = vand.u32 2147483648, %v641_v61  ;;  %vm647_vm11 = vweird.f32 %v641_v61  ;;  %v651_v16 = vand.u32 2147483647, %v641_v61 }
 0xe68   :  { %v654_v21 = vor.u32 1.1754944e-38, %v653_v12  ;;  %vm652_vm13 = vcmp.eq.f32.partialorder %v651_v16, 8.507059e+37 }
 0xe6c   :  { %v1915_v3 = vpop.eup %1914 }
 0xe6d   :  { %v643_v4 = vmul.f32 %v1915_v3, %v641_v61  ;;  %vm648_vm10 = vweird.f32 %v1915_v3 }
 0xe6e   :  { %vm649_vm12 = vmor %vm647_vm11, %vm648_vm10 }
 0xe6f   :  { %v644_v9 = vsub.f32 1.0, %v643_v4 }
 0xe71   :  { %v645_v10 = vmul.f32 %v1915_v3, %v644_v9 }
 0xe73   :  { %v646_v11 = vadd.f32 %v1915_v3, %v645_v10 }
 0xe75   :  { %v650_v13 = vsel %vm649_vm12, %v1915_v3, %v646_v11  ;;  %v2383_v3 = vperm.slane %v2168_v19, 1 }
 0xe76   :  { %v655_v24 = vsel %vm652_vm13, %v654_v21, %v650_v13 }
 0xe77   :  { %v658_v26 = vmul.f32 %v655_v24, %v600_v49 }
 0xed4   :  { %v661_v23 = vpop.permute.xlu0 %660 }
 0xed5   :  { %v663_v25 = vmul.f32 %v661_v23, %v655_v24 }
 0xed7   :  { %665 = vrot.lane.b32.xlu1 %v663_v25, %s2024_s4 }
 0xf49   :  { %v666_v27 = vpop.permute.xlu1 %665 }
 0xf4a   :  { %v668_v28 = vadd.f32 %v666_v27, %v658_v26 }
 0xf4c   :  { %1916 = vtanh.f32 %v668_v28 }
 0xf52   :  { %v1917_v29 = vpop.eup %1916 }
 0xf53   :  { %671 = vrot.lane.b32.xlu2 %v1917_v29, %s2023_s12 }
 0xfad   :  { %v672_v30 = vpop.permute.xlu2 %671 }
 0xfae   :  { %v674_v31 = vmul.f32 %v672_v30, %v655_v24 }
 0xfb0   :  { %676 = vrot.lane.b32.xlu0 %v674_v31, %s2024_s4 }
0x1022   :  { %v677_v32 = vpop.permute.xlu0 %676 }
0x1023   :  { %680 = vst.msk [vmem:[#allocation4 + $0x30] sm:$0xff] %vm53_vm0, %v677_v32  ;;  %1805 = vmatmul.msk.f32.vlgmr.msra.gmra.mxu3 %vm53_vm0, %v677_v32 }
0x1024   :  { %967 = vmatpush.msra.mxu3 %v2343_v53 }
0x1026   :  { %968 = vmatpush.msra.mxu3 %v2348_v54 }
0x1028   :  { %969 = vmatpush.msra.mxu3 %v2355_v55 }
0x102a   :  { %v1567_v33 = vld [vmem:[#allocation4 + $0x30] sm:$0xff]  ;;  %970 = vmatpush.msra.mxu3 %v2362_v56 }
0x102b   :  { %1846 = vmatmul.msk.f32.gmra.mxu1 %vm53_vm0, %v1567_v33 }
0x10a6   :  { %v702_v35 = vpop.f32.mrf.mxu3 }
0x10a7   :  { %v705_v36 = vadd.f32 %v702_v35, %v123_v34 }
0x10a9   :  { %1918 = vtanh.f32 %v705_v36  ;;  %v1806_v5 = vmul.f32 -1.442695, %v705_v36 }
0x10ab   :  { %1920 = vpow2.f32 %v1806_v5 }
0x10af   :  { %v1919_v37 = vpop.eup %1918 }
0x10b0   :  { %728 = vrot.lane.b32.xlu1 %v1919_v37, %s2023_s12 }
0x10b1   :  { %v1921_v6 = vpop.eup %1920 }
0x10b2   :  { %v709_v7 = vadd.f32 1.0, %v1921_v6 }
0x10b4   :  { %1922 = vrcp.f32 %v709_v7  ;;  %v721_v15 = vand.u32 2147483648, %v709_v7  ;;  %vm715_vm15 = vweird.f32 %v709_v7  ;;  %v719_v17 = vand.u32 2147483647, %v709_v7 }
0x10b6   :  { %v722_v43 = vor.u32 1.1754944e-38, %v721_v15  ;;  %vm720_vm2 = vcmp.eq.f32.partialorder %v719_v17, 8.507059e+37 }
0x10ba   :  { %v1923_v38 = vpop.eup %1922 }
0x10bb   :  { %v711_v39 = vmul.f32 %v1923_v38, %v709_v7  ;;  %vm716_vm14 = vweird.f32 %v1923_v38 }
0x10bc   :  { %vm717_vm1 = vmor %vm715_vm15, %vm716_vm14 }
0x10bd   :  { %v712_v8 = vsub.f32 1.0, %v711_v39 }
0x10bf   :  { %v713_v40 = vmul.f32 %v1923_v38, %v712_v8 }
0x10c1   :  { %v714_v41 = vadd.f32 %v1923_v38, %v713_v40 }
0x10c3   :  { %v718_v42 = vsel %vm717_vm1, %v1923_v38, %v714_v41 }
0x10c4   :  { %v723_v45 = vsel %vm720_vm2, %v722_v43, %v718_v42 }
0x10c5   :  { %v726_v47 = vmul.f32 %v723_v45, %v668_v28 }
0x1122   :  { %v729_v44 = vpop.permute.xlu1 %728 }
0x1123   :  { %v731_v46 = vmul.f32 %v729_v44, %v723_v45 }
0x1125   :  { %733 = vrot.lane.b32.xlu2 %v731_v46, %s2024_s4 }
0x117f   :  { %v734_v48 = vpop.permute.xlu2 %733 }
0x1180   :  { %v2335_v49 = vadd.f32 %v734_v48, %v726_v47 }
0x1182   :  { %1924 = vtanh.f32 %v2335_v49 }
0x1188   :  { %v1925_v50 = vpop.eup %1924 }
0x1189   :  { %739 = vrot.lane.b32.xlu0 %v1925_v50, %s2023_s12 }
0x11fb   :  { %v740_v51 = vpop.permute.xlu0 %739 }
0x11fc   :  { %v742_v52 = vmul.f32 %v740_v51, %v723_v45 }
0x11fe   :  { %744 = vrot.lane.b32.xlu1 %v742_v52, %s2024_s4 }
0x1270   :  { %v745_v57 = vpop.permute.xlu1 %744 }
0x1271   :  { %748 = vst.msk [vmem:[#allocation4 + $0x38] sm:$0xff] %vm53_vm0, %v745_v57  ;;  %1807 = vmatmul.msk.f32.vlgmr.msrb.gmra.mxu2 %vm53_vm0, %v745_v57 }
0x1272   :  { %1035 = vmatpush.msrb.mxu2 %v2343_v53 }
0x1274   :  { %1036 = vmatpush.msrb.mxu2 %v2348_v54 }
0x1276   :  { %1037 = vmatpush.msrb.mxu2 %v2355_v55 }
0x1278   :  { %v1568_v58 = vld [vmem:[#allocation4 + $0x38] sm:$0xff]  ;;  %1038 = vmatpush.msrb.mxu2 %v2362_v56 }
0x1279   :  { %903 = vmatmul.f32.vlgmr.msra.gmra.mxu2 %v2022_v14  ;;  %1847 = vmatmul.msk.f32.gmra.mxu1 %vm53_vm0, %v1568_v58  ;;  %v176_v14 = vadd.f32 %v2262_v2, %v2383_v3 }
0x127a   :  { %1171 = vmatpush.msra.mxu2 %v2343_v53 }
0x127c   :  { %1172 = vmatpush.msra.mxu2 %v2348_v54 }
0x127e   :  { %1173 = vmatpush.msra.mxu2 %v2355_v55 }
0x1280   :  { %1174 = vmatpush.msra.mxu2 %v2362_v56 }
0x12f4   :  { %v770_v60 = vpop.f32.mrf.mxu2 }
0x12f5   :  { %v773_v61 = vadd.f32 %v770_v60, %v126_v59  ;;  %v129_v59 = vadd.f32 %v2170_v20, %v2173_v22 }
0x12f7   :  { %1926 = vtanh.f32 %v773_v61  ;;  %v1808_v12 = vmul.f32 -1.442695, %v773_v61 }
0x12fc   :  { %v904_v4 = vpop.f32.mrf.mxu2 }
0x12fd   :  { %v1927_v9 = vpop.eup %1926  ;;  %v907_v10 = vadd.f32 %v904_v4, %v176_v14  ;;  %v173_v14 = vadd.f32 %v2260_v1, %v2383_v3 }
0x12fe   :  { %796 = vrot.lane.b32.xlu2 %v1927_v9, %s2023_s12 }
0x12ff   :  { %1928 = vtanh.f32 %v907_v10  ;;  %v1811_v23 = vmul.f32 -1.442695, %v907_v10 }
0x1300   :  { %1930 = vpow2.f32 %v1808_v12 }
0x1305   :  { %v1929_v11 = vpop.eup %1928 }
0x1306   :  { %930 = vrot.lane.b32.xlu0 %v1929_v11, %s2023_s12  ;;  %v1931_v18 = vpop.eup %1930 }
0x1307   :  { %v777_v16 = vadd.f32 1.0, %v1931_v18 }
0x1309   :  { %1932 = vrcp.f32 %v777_v16  ;;  %v789_v25 = vand.u32 2147483648, %v777_v16  ;;  %vm783_vm4 = vweird.f32 %v777_v16  ;;  %v787_v26 = vand.u32 2147483647, %v777_v16 }
0x130a   :  { %1934 = vpow2.f32 %v1811_v23 }
0x130b   :  { %v790_v29 = vor.u32 1.1754944e-38, %v789_v25  ;;  %vm788_vm6 = vcmp.eq.f32.partialorder %v787_v26, 8.507059e+37 }
0x130f   :  { %v1933_v13 = vpop.eup %1932 }
0x1310   :  { %v779_v19 = vmul.f32 %v1933_v13, %v777_v16  ;;  %vm784_vm3 = vweird.f32 %v1933_v13  ;;  %v1935_v27 = vpop.eup %1934 }
0x1311   :  { %vm785_vm5 = vmor %vm783_vm4, %vm784_vm3  ;;  %v911_v30 = vadd.f32 1.0, %v1935_v27 }
0x1312   :  { %v780_v21 = vsub.f32 1.0, %v779_v19 }
0x1313   :  { %1936 = vrcp.f32 %v911_v30  ;;  %v923_v6 = vand.u32 2147483648, %v911_v30  ;;  %vm917_vm8 = vweird.f32 %v911_v30  ;;  %v921_v7 = vand.u32 2147483647, %v911_v30 }
0x1314   :  { %v781_v24 = vmul.f32 %v1933_v13, %v780_v21 }
0x1315   :  { %v924_v39 = vor.u32 1.1754944e-38, %v923_v6  ;;  %vm922_vm10 = vcmp.eq.f32.partialorder %v921_v7, 8.507059e+37 }
0x1316   :  { %v782_v2 = vadd.f32 %v1933_v13, %v781_v24 }
0x1318   :  { %v786_v28 = vsel %vm785_vm5, %v1933_v13, %v782_v2 }
0x1319   :  { %v791_v32 = vsel %vm788_vm6, %v790_v29, %v786_v28  ;;  %v1937_v34 = vpop.eup %1936 }
0x131a   :  { %v913_v35 = vmul.f32 %v1937_v34, %v911_v30  ;;  %vm918_vm7 = vweird.f32 %v1937_v34  ;;  %v794_v15 = vmul.f32 %v791_v32, %v2335_v49 }
0x131b   :  { %vm919_vm9 = vmor %vm917_vm8, %vm918_vm7 }
0x131c   :  { %v914_v36 = vsub.f32 1.0, %v913_v35 }
0x131e   :  { %v915_v37 = vmul.f32 %v1937_v34, %v914_v36 }
0x1320   :  { %v916_v5 = vadd.f32 %v1937_v34, %v915_v37 }
0x1322   :  { %v920_v38 = vsel %vm919_vm9, %v1937_v34, %v916_v5  ;;  %v170_v34 = vadd.f32 %v2258_v0, %v2383_v3 }
0x1323   :  { %v925_v40 = vsel %vm922_vm10, %v924_v39, %v920_v38 }
0x1324   :  { %v928_v43 = vmul.f32 0.0, %v925_v40 }
0x1358   :  { %v797_v31 = vpop.permute.xlu2 %796 }
0x1359   :  { %v799_v33 = vmul.f32 %v797_v31, %v791_v32 }
0x135b   :  { %801 = vrot.lane.b32.xlu1 %v799_v33, %s2024_s4 }
0x1378   :  { %v931_v8 = vpop.permute.xlu0 %930 }
0x1379   :  { %v933_v41 = vmul.f32 %v931_v8, %v925_v40 }
0x137b   :  { %935 = vrot.lane.b32.xlu2 %v933_v41, %s2024_s4 }
0x13cd   :  { %v802_v17 = vpop.permute.xlu1 %801 }
0x13ce   :  { %v2392_v42 = vadd.f32 %v802_v17, %v794_v15 }
0x13d0   :  { %1938 = vtanh.f32 %v2392_v42 }
0x13d5   :  { %v936_v44 = vpop.permute.xlu2 %935 }
0x13d6   :  { %v1939_v45 = vpop.eup %1938  ;;  %v938_v46 = vadd.f32 %v936_v44, %v928_v43 }
0x13d7   :  { %807 = vrot.lane.b32.xlu0 %v1939_v45, %s2023_s12 }
0x13d8   :  { %1940 = vtanh.f32 %v938_v46 }
0x13de   :  { %v1941_v47 = vpop.eup %1940 }
0x13df   :  { %941 = vrot.lane.b32.xlu1 %v1941_v47, %s2023_s12 }
0x1449   :  { %v808_v48 = vpop.permute.xlu0 %807 }
0x144a   :  { %v810_v50 = vmul.f32 %v808_v48, %v791_v32 }
0x144c   :  { %812 = vrot.lane.b32.xlu2 %v810_v50, %s2024_s4 }
0x1451   :  { %v942_v49 = vpop.permute.xlu1 %941 }
0x1452   :  { %v944_v51 = vmul.f32 %v942_v49, %v925_v40 }
0x1454   :  { %946 = vrot.lane.b32.xlu0 %v944_v51, %s2024_s4 }
0x14a6   :  { %v813_v52 = vpop.permute.xlu2 %812 }
0x14a7   :  { %816 = vst.msk [vmem:[#allocation4 + $0x40] sm:$0xff] %vm53_vm0, %v813_v52  ;;  %1809 = vmatmul.msk.f32.vlgmr.msrb.gmra.mxu3 %vm53_vm0, %v813_v52 }
0x14a8   :  { %1103 = vmatpush.msrb.mxu3 %v2343_v53 }
0x14aa   :  { %1104 = vmatpush.msrb.mxu3 %v2348_v54 }
0x14ac   :  { %1105 = vmatpush.msrb.mxu3 %v2355_v55 }
0x14ae   :  { %v1569_v57 = vld [vmem:[#allocation4 + $0x40] sm:$0xff]  ;;  %1106 = vmatpush.msrb.mxu3 %v2362_v56 }
0x14af   :  { %1848 = vmatmul.msk.f32.gmra.mxu1 %vm53_vm0, %v1569_v57 }
0x14c6   :  { %v947_v58 = vpop.permute.xlu0 %946 }
0x14c7   :  { %950 = vst.msk [vmem:[#allocation5 + $0x48] sm:$0xff] %vm53_vm0, %v947_v58  ;;  %1812 = vmatmul.msk.f32.vlgmr.msra.gmra.mxu3 %vm53_vm0, %v947_v58  ;;  %v167_v58 = vadd.f32 %v2256_v63, %v2383_v3 }
0x14c8   :  { %1239 = vmatpush.msra.mxu3 %v2343_v53 }
0x14ca   :  { %1240 = vmatpush.msra.mxu3 %v2348_v54 }
0x14cc   :  { %1241 = vmatpush.msra.mxu3 %v2355_v55 }
0x14ce   :  { %1242 = vmatpush.msra.mxu3 %v2362_v56 }
0x152a   :  { %v838_v60 = vpop.f32.mrf.mxu3 }
0x152b   :  { %v2414_v61 = vadd.f32 %v838_v60, %v129_v59 }
0x154a   :  { %v972_v4 = vpop.f32.mrf.mxu3 }
0x154b   :  { %v975_v9 = vadd.f32 %v972_v4, %v173_v14 }
0x154d   :  { %1942 = vtanh.f32 %v975_v9  ;;  %v1813_v11 = vmul.f32 -1.442695, %v975_v9 }
0x154f   :  { %1944 = vpow2.f32 %v1813_v11 }
0x1553   :  { %v1943_v10 = vpop.eup %1942 }
0x1554   :  { %998 = vrot.lane.b32.xlu1 %v1943_v10, %s2023_s12 }
0x1555   :  { %v1945_v12 = vpop.eup %1944 }
0x1556   :  { %v979_v18 = vadd.f32 1.0, %v1945_v12 }
0x1558   :  { %1946 = vrcp.f32 %v979_v18  ;;  %v991_v21 = vand.u32 2147483648, %v979_v18  ;;  %vm985_vm12 = vweird.f32 %v979_v18  ;;  %v989_v1 = vand.u32 2147483647, %v979_v18 }
0x155a   :  { %v992_v24 = vor.u32 1.1754944e-38, %v991_v21  ;;  %vm990_vm14 = vcmp.eq.f32.partialorder %v989_v1, 8.507059e+37 }
0x155e   :  { %v1947_v16 = vpop.eup %1946 }
0x155f   :  { %v981_v13 = vmul.f32 %v1947_v16, %v979_v18  ;;  %vm986_vm11 = vweird.f32 %v1947_v16 }
0x1560   :  { %vm987_vm13 = vmor %vm985_vm12, %vm986_vm11 }
0x1561   :  { %v982_v20 = vsub.f32 1.0, %v981_v13 }
0x1563   :  { %v983_v22 = vmul.f32 %v1947_v16, %v982_v20 }
0x1565   :  { %v984_v19 = vadd.f32 %v1947_v16, %v983_v22 }
0x1567   :  { %v988_v23 = vsel %vm987_vm13, %v1947_v16, %v984_v19 }
0x1568   :  { %v993_v25 = vsel %vm990_vm14, %v992_v24, %v988_v23 }
0x1569   :  { %v996_v27 = vmul.f32 %v993_v25, %v938_v46 }
0x15c6   :  { %v999_v2 = vpop.permute.xlu1 %998 }
0x15c7   :  { %v1001_v26 = vmul.f32 %v999_v2, %v993_v25 }
0x15c9   :  { %1003 = vrot.lane.b32.xlu2 %v1001_v26, %s2024_s4 }
0x1623   :  { %v1004_v28 = vpop.permute.xlu2 %1003 }
0x1624   :  { %v1006_v29 = vadd.f32 %v1004_v28, %v996_v27 }
0x1626   :  { %1948 = vtanh.f32 %v1006_v29 }
0x162c   :  { %v1949_v30 = vpop.eup %1948 }
0x162d   :  { %1009 = vrot.lane.b32.xlu0 %v1949_v30, %s2023_s12  ;;  %v164_v30 = vadd.f32 %v2254_v62, %v2383_v3 }
0x169f   :  { %v1010_v31 = vpop.permute.xlu0 %1009 }
0x16a0   :  { %v1012_v32 = vmul.f32 %v1010_v31, %v993_v25 }
0x16a2   :  { %1014 = vrot.lane.b32.xlu1 %v1012_v32, %s2024_s4 }
0x1714   :  { %v1015_v33 = vpop.permute.xlu1 %1014 }
0x1715   :  { %1018 = vst.msk [vmem:[#allocation5 + $0x40] sm:$0xff] %vm53_vm0, %v1015_v33  ;;  %1814 = vmatmul.msk.f32.vlgmr.msrb.gmra.mxu2 %vm53_vm0, %v1015_v33 }
0x1716   :  { %1307 = vmatpush.msrb.mxu2 %v2343_v53 }
0x1718   :  { %1308 = vmatpush.msrb.mxu2 %v2348_v54 }
0x171a   :  { %1309 = vmatpush.msrb.mxu2 %v2355_v55 }
0x171c   :  { %1310 = vmatpush.msrb.mxu2 %v2362_v56 }
0x1798   :  { %v1040_v35 = vpop.f32.mrf.mxu2 }
0x1799   :  { %v1043_v36 = vadd.f32 %v1040_v35, %v170_v34 }
0x179b   :  { %1950 = vtanh.f32 %v1043_v36  ;;  %v1815_v5 = vmul.f32 -1.442695, %v1043_v36 }
0x179d   :  { %1952 = vpow2.f32 %v1815_v5 }
0x17a1   :  { %v1951_v37 = vpop.eup %1950 }
0x17a2   :  { %1066 = vrot.lane.b32.xlu2 %v1951_v37, %s2023_s12 }
0x17a3   :  { %v1953_v6 = vpop.eup %1952 }
0x17a4   :  { %v1047_v7 = vadd.f32 1.0, %v1953_v6 }
0x17a6   :  { %1954 = vrcp.f32 %v1047_v7  ;;  %v1059_v15 = vand.u32 2147483648, %v1047_v7  ;;  %vm1053_vm1 = vweird.f32 %v1047_v7  ;;  %v1057_v0 = vand.u32 2147483647, %v1047_v7 }
0x17a8   :  { %v1060_v43 = vor.u32 1.1754944e-38, %v1059_v15  ;;  %vm1058_vm3 = vcmp.eq.f32.partialorder %v1057_v0, 8.507059e+37 }
0x17ac   :  { %v1955_v38 = vpop.eup %1954 }
0x17ad   :  { %v1049_v39 = vmul.f32 %v1955_v38, %v1047_v7  ;;  %vm1054_vm15 = vweird.f32 %v1955_v38 }
0x17ae   :  { %vm1055_vm2 = vmor %vm1053_vm1, %vm1054_vm15 }
0x17af   :  { %v1050_v8 = vsub.f32 1.0, %v1049_v39 }
0x17b1   :  { %v1051_v40 = vmul.f32 %v1955_v38, %v1050_v8 }
0x17b3   :  { %v1052_v41 = vadd.f32 %v1955_v38, %v1051_v40 }
0x17b5   :  { %v1056_v17 = vsel %vm1055_vm2, %v1955_v38, %v1052_v41 }
0x17b6   :  { %v1061_v45 = vsel %vm1058_vm3, %v1060_v43, %v1056_v17 }
0x17b7   :  { %v1064_v47 = vmul.f32 %v1061_v45, %v1006_v29 }
0x17fc   :  { %v1067_v44 = vpop.permute.xlu2 %1066 }
0x17fd   :  { %v1069_v46 = vmul.f32 %v1067_v44, %v1061_v45 }
0x17ff   :  { %1071 = vrot.lane.b32.xlu0 %v1069_v46, %s2024_s4 }
0x1871   :  { %v1072_v48 = vpop.permute.xlu0 %1071 }
0x1872   :  { %v1074_v50 = vadd.f32 %v1072_v48, %v1064_v47 }
0x1874   :  { %1956 = vtanh.f32 %v1074_v50 }
0x187a   :  { %v1957_v49 = vpop.eup %1956 }
0x187b   :  { %1077 = vrot.lane.b32.xlu1 %v1957_v49, %s2023_s12 }
0x18ed   :  { %v1078_v51 = vpop.permute.xlu1 %1077 }
0x18ee   :  { %v1080_v52 = vmul.f32 %v1078_v51, %v1061_v45 }
0x18f0   :  { %1082 = vrot.lane.b32.xlu2 %v1080_v52, %s2024_s4 }
0x194a   :  { %v1083_v57 = vpop.permute.xlu2 %1082 }
0x194b   :  { %1086 = vst.msk [vmem:[#allocation5 + $0x38] sm:$0xff] %vm53_vm0, %v1083_v57  ;;  %1816 = vmatmul.msk.f32.vlgmr.msrb.gmra.mxu3 %vm53_vm0, %v1083_v57 }
0x194c   :  { %1375 = vmatpush.msrb.mxu3 %v2343_v53 }
0x194e   :  { %1376 = vmatpush.msrb.mxu3 %v2348_v54 }
0x1950   :  { %1377 = vmatpush.msrb.mxu3 %v2355_v55 }
0x1952   :  { %1378 = vmatpush.msrb.mxu3 %v2362_v56 }
0x19ce   :  { %v1108_v59 = vpop.f32.mrf.mxu3 }
0x19cf   :  { %v1111_v60 = vadd.f32 %v1108_v59, %v167_v58 }
0x19d1   :  { %1958 = vtanh.f32 %v1111_v60  ;;  %v1817_v4 = vmul.f32 -1.442695, %v1111_v60 }
0x19d3   :  { %1960 = vpow2.f32 %v1817_v4 }
0x19d7   :  { %v1959_v14 = vpop.eup %1958 }
0x19d8   :  { %1134 = vrot.lane.b32.xlu0 %v1959_v14, %s2023_s12 }
0x19d9   :  { %v1961_v9 = vpop.eup %1960 }
0x19da   :  { %v1115_v10 = vadd.f32 1.0, %v1961_v9 }
0x19dc   :  { %1962 = vrcp.f32 %v1115_v10  ;;  %v1127_v20 = vand.u32 2147483648, %v1115_v10  ;;  %vm1121_vm5 = vweird.f32 %v1115_v10  ;;  %v1125_v63 = vand.u32 2147483647, %v1115_v10 }
0x19de   :  { %v1128_v19 = vor.u32 1.1754944e-38, %v1127_v20  ;;  %vm1126_vm7 = vcmp.eq.f32.partialorder %v1125_v63, 8.507059e+37 }
0x19e2   :  { %v1963_v11 = vpop.eup %1962 }
0x19e3   :  { %v1117_v12 = vmul.f32 %v1963_v11, %v1115_v10  ;;  %vm1122_vm4 = vweird.f32 %v1963_v11 }
0x19e4   :  { %vm1123_vm6 = vmor %vm1121_vm5, %vm1122_vm4 }
0x19e5   :  { %v1118_v18 = vsub.f32 1.0, %v1117_v12 }
0x19e7   :  { %v1119_v16 = vmul.f32 %v1963_v11, %v1118_v18 }
0x19e9   :  { %v1120_v13 = vadd.f32 %v1963_v11, %v1119_v16 }
0x19eb   :  { %v1124_v22 = vsel %vm1123_vm6, %v1963_v11, %v1120_v13 }
0x19ec   :  { %v1129_v1 = vsel %vm1126_vm7, %v1128_v19, %v1124_v22 }
0x19ed   :  { %v1132_v24 = vmul.f32 %v1129_v1, %v1074_v50  ;;  %v2464_v50 = vpop.f32.mrf.mxu1 }
0x19f5   :  { %v2466_v49 = vpop.f32.mrf.mxu1 }
0x19fd   :  { %v2468_v51 = vpop.f32.mrf.mxu1 }
0x1a05   :  { %v157_v52 = vpop.f32.mrf.mxu1 }
0x1a0d   :  { %v160_v57 = vpop.f32.mrf.mxu1 }
0x1a0e   :  { %v161_v58 = vadd.f32 %v160_v57, %v2383_v3 }
0x1a4a   :  { %v1135_v21 = vpop.permute.xlu0 %1134 }
0x1a4b   :  { %v1137_v23 = vmul.f32 %v1135_v21, %v1129_v1 }
0x1a4d   :  { %1139 = vrot.lane.b32.xlu1 %v1137_v23, %s2024_s4 }
0x1abf   :  { %v1140_v2 = vpop.permute.xlu1 %1139 }
0x1ac0   :  { %v1142_v25 = vadd.f32 %v1140_v2, %v1132_v24 }
0x1ac2   :  { %1964 = vtanh.f32 %v1142_v25 }
0x1ac8   :  { %v1965_v26 = vpop.eup %1964 }
0x1ac9   :  { %1145 = vrot.lane.b32.xlu2 %v1965_v26, %s2023_s12  ;;  %v158_v26 = vadd.f32 %v157_v52, %v2383_v3 }
0x1b23   :  { %v1146_v27 = vpop.permute.xlu2 %1145 }
0x1b24   :  { %v1148_v28 = vmul.f32 %v1146_v27, %v1129_v1 }
0x1b26   :  { %1150 = vrot.lane.b32.xlu0 %v1148_v28, %s2024_s4 }
0x1b98   :  { %v1151_v29 = vpop.permute.xlu0 %1150 }
0x1b99   :  { %1154 = vst.msk [vmem:[#allocation5 + $0x30] sm:$0xff] %vm53_vm0, %v1151_v29  ;;  %1818 = vmatmul.msk.f32.vlgmr.msra.gmra.mxu2 %vm53_vm0, %v1151_v29 }
0x1b9a   :  { %1443 = vmatpush.msra.mxu2 %v2343_v53 }
0x1b9c   :  { %1444 = vmatpush.msra.mxu2 %v2348_v54 }
0x1b9e   :  { %1445 = vmatpush.msra.mxu2 %v2355_v55 }
0x1ba0   :  { %1446 = vmatpush.msra.mxu2 %v2362_v56 }
0x1c1c   :  { %v1176_v31 = vpop.f32.mrf.mxu2 }
0x1c1d   :  { %v1179_v32 = vadd.f32 %v1176_v31, %v164_v30 }
0x1c1f   :  { %1966 = vtanh.f32 %v1179_v32  ;;  %v1819_v34 = vmul.f32 -1.442695, %v1179_v32 }
0x1c21   :  { %1968 = vpow2.f32 %v1819_v34 }
0x1c25   :  { %v1967_v33 = vpop.eup %1966 }
0x1c26   :  { %1202 = vrot.lane.b32.xlu1 %v1967_v33, %s2023_s12 }
0x1c27   :  { %v1969_v35 = vpop.eup %1968 }
0x1c28   :  { %v1183_v36 = vadd.f32 1.0, %v1969_v35 }
0x1c2a   :  { %1970 = vrcp.f32 %v1183_v36  ;;  %v1195_v39 = vand.u32 2147483648, %v1183_v36  ;;  %vm1189_vm9 = vweird.f32 %v1183_v36  ;;  %v1193_v62 = vand.u32 2147483647, %v1183_v36 }
0x1c2c   :  { %v1196_v40 = vor.u32 1.1754944e-38, %v1195_v39  ;;  %vm1194_vm11 = vcmp.eq.f32.partialorder %v1193_v62, 8.507059e+37 }
0x1c30   :  { %v1971_v37 = vpop.eup %1970 }
0x1c31   :  { %v1185_v5 = vmul.f32 %v1971_v37, %v1183_v36  ;;  %vm1190_vm8 = vweird.f32 %v1971_v37 }
0x1c32   :  { %vm1191_vm10 = vmor %vm1189_vm9, %vm1190_vm8 }
0x1c33   :  { %v1186_v6 = vsub.f32 1.0, %v1185_v5 }
0x1c35   :  { %v1187_v7 = vmul.f32 %v1971_v37, %v1186_v6 }
0x1c37   :  { %v1188_v38 = vadd.f32 %v1971_v37, %v1187_v7 }
0x1c39   :  { %v1192_v8 = vsel %vm1191_vm10, %v1971_v37, %v1188_v38 }
0x1c3a   :  { %v1197_v15 = vsel %vm1194_vm11, %v1196_v40, %v1192_v8 }
0x1c3b   :  { %v1200_v17 = vmul.f32 %v1197_v15, %v1142_v25 }
0x1c98   :  { %v1203_v41 = vpop.permute.xlu1 %1202 }
0x1c99   :  { %v1205_v0 = vmul.f32 %v1203_v41, %v1197_v15 }
0x1c9b   :  { %1207 = vrot.lane.b32.xlu2 %v1205_v0, %s2024_s4 }
0x1cf5   :  { %v1208_v43 = vpop.permute.xlu2 %1207 }
0x1cf6   :  { %v1210_v44 = vadd.f32 %v1208_v43, %v1200_v17 }
0x1cf8   :  { %1972 = vtanh.f32 %v1210_v44 }
0x1cfe   :  { %v1973_v45 = vpop.eup %1972 }
0x1cff   :  { %1213 = vrot.lane.b32.xlu0 %v1973_v45, %s2023_s12  ;;  %v155_v45 = vadd.f32 %v2468_v51, %v2383_v3 }
0x1d71   :  { %v1214_v46 = vpop.permute.xlu0 %1213 }
0x1d72   :  { %v1216_v47 = vmul.f32 %v1214_v46, %v1197_v15 }
0x1d74   :  { %1218 = vrot.lane.b32.xlu1 %v1216_v47, %s2024_s4 }
0x1de6   :  { %v1219_v48 = vpop.permute.xlu1 %1218 }
0x1de7   :  { %1222 = vst.msk [vmem:[#allocation5 + $0x28] sm:$0xff] %vm53_vm0, %v1219_v48  ;;  %1820 = vmatmul.msk.f32.vlgmr.msra.gmra.mxu3 %vm53_vm0, %v1219_v48 }
0x1de8   :  { %1510 = vmatpush.msra.mxu3 %v2343_v53 }
0x1dea   :  { %1511 = vmatpush.msra.mxu3 %v2348_v54 }
0x1dec   :  { %1512 = vmatpush.msra.mxu3 %v2355_v55 }
0x1dee   :  { %1513 = vmatpush.msra.mxu3 %v2362_v56 }
0x1e6a   :  { %v1244_v59 = vpop.f32.mrf.mxu3 }
0x1e6b   :  { %v1247_v60 = vadd.f32 %v1244_v59, %v161_v58 }
0x1e6d   :  { %1974 = vtanh.f32 %v1247_v60  ;;  %v1821_v54 = vmul.f32 -1.442695, %v1247_v60 }
0x1e6f   :  { %1976 = vpow2.f32 %v1821_v54 }
0x1e73   :  { %v1975_v53 = vpop.eup %1974 }
0x1e74   :  { %1270 = vrot.lane.b32.xlu2 %v1975_v53, %s2023_s12 }
0x1e75   :  { %v1977_v55 = vpop.eup %1976 }
0x1e76   :  { %v1251_v56 = vadd.f32 1.0, %v1977_v55 }
0x1e78   :  { %1978 = vrcp.f32 %v1251_v56  ;;  %v1263_v12 = vand.u32 2147483648, %v1251_v56  ;;  %vm1257_vm13 = vweird.f32 %v1251_v56  ;;  %v1261_v18 = vand.u32 2147483647, %v1251_v56 }
0x1e7a   :  { %v1264_v13 = vor.u32 1.1754944e-38, %v1263_v12  ;;  %vm1262_vm15 = vcmp.eq.f32.partialorder %v1261_v18, 8.507059e+37 }
0x1e7e   :  { %v1979_v14 = vpop.eup %1978 }
0x1e7f   :  { %v1253_v4 = vmul.f32 %v1979_v14, %v1251_v56  ;;  %vm1258_vm12 = vweird.f32 %v1979_v14 }
0x1e80   :  { %vm1259_vm14 = vmor %vm1257_vm13, %vm1258_vm12 }
0x1e81   :  { %v1254_v9 = vsub.f32 1.0, %v1253_v4 }
0x1e83   :  { %v1255_v10 = vmul.f32 %v1979_v14, %v1254_v9 }
0x1e85   :  { %v1256_v11 = vadd.f32 %v1979_v14, %v1255_v10 }
0x1e87   :  { %v1260_v16 = vsel %vm1259_vm14, %v1979_v14, %v1256_v11 }
0x1e88   :  { %v1265_v63 = vsel %vm1262_vm15, %v1264_v13, %v1260_v16 }
0x1e89   :  { %v1268_v19 = vmul.f32 %v1265_v63, %v1210_v44 }
0x1ece   :  { %v1271_v20 = vpop.permute.xlu2 %1270 }
0x1ecf   :  { %v1273_v22 = vmul.f32 %v1271_v20, %v1265_v63 }
0x1ed1   :  { %1275 = vrot.lane.b32.xlu0 %v1273_v22, %s2024_s4 }
0x1f43   :  { %v1276_v21 = vpop.permute.xlu0 %1275 }
0x1f44   :  { %v1278_v1 = vadd.f32 %v1276_v21, %v1268_v19  ;;  %v152_v19 = vadd.f32 %v2466_v49, %v2383_v3 }
0x1f46   :  { %1980 = vtanh.f32 %v1278_v1 }
0x1f4c   :  { %v1981_v23 = vpop.eup %1980 }
0x1f4d   :  { %1281 = vrot.lane.b32.xlu1 %v1981_v23, %s2023_s12 }
0x1fbf   :  { %v1282_v24 = vpop.permute.xlu1 %1281 }
0x1fc0   :  { %v1284_v2 = vmul.f32 %v1282_v24, %v1265_v63 }
0x1fc2   :  { %1286 = vrot.lane.b32.xlu2 %v1284_v2, %s2024_s4 }
0x201c   :  { %v1287_v25 = vpop.permute.xlu2 %1286 }
0x201d   :  { %1290 = vst.msk [vmem:[#allocation5 + $0x20] sm:$0xff] %vm53_vm0, %v1287_v25  ;;  %1822 = vmatmul.msk.f32.vlgmr.msrb.gmra.mxu2 %vm53_vm0, %v1287_v25 }
0x20a0   :  { %v1312_v27 = vpop.f32.mrf.mxu2 }
0x20a1   :  { %v1315_v28 = vadd.f32 %v1312_v27, %v158_v26 }
0x20a3   :  { %1982 = vtanh.f32 %v1315_v28  ;;  %v1823_v30 = vmul.f32 -1.442695, %v1315_v28 }
0x20a5   :  { %1984 = vpow2.f32 %v1823_v30 }
0x20a9   :  { %v1983_v29 = vpop.eup %1982 }
0x20aa   :  { %1338 = vrot.lane.b32.xlu0 %v1983_v29, %s2023_s12 }
0x20ab   :  { %v1985_v31 = vpop.eup %1984 }
0x20ac   :  { %v1319_v32 = vadd.f32 1.0, %v1985_v31 }
0x20ae   :  { %1986 = vrcp.f32 %v1319_v32  ;;  %v1331_v5 = vand.u32 2147483648, %v1319_v32  ;;  %vm1325_vm2 = vweird.f32 %v1319_v32  ;;  %v1329_v6 = vand.u32 2147483647, %v1319_v32 }
0x20b0   :  { %v1332_v38 = vor.u32 1.1754944e-38, %v1331_v5  ;;  %vm1330_vm4 = vcmp.eq.f32.partialorder %v1329_v6, 8.507059e+37 }
0x20b4   :  { %v1987_v33 = vpop.eup %1986 }
0x20b5   :  { %v1321_v34 = vmul.f32 %v1987_v33, %v1319_v32  ;;  %vm1326_vm1 = vweird.f32 %v1987_v33 }
0x20b6   :  { %vm1327_vm3 = vmor %vm1325_vm2, %vm1326_vm1 }
0x20b7   :  { %v1322_v35 = vsub.f32 1.0, %v1321_v34 }
0x20b9   :  { %v1323_v36 = vmul.f32 %v1987_v33, %v1322_v35 }
0x20bb   :  { %v1324_v37 = vadd.f32 %v1987_v33, %v1323_v36 }
0x20bd   :  { %v1328_v7 = vsel %vm1327_vm3, %v1987_v33, %v1324_v37 }
0x20be   :  { %v1333_v62 = vsel %vm1330_vm4, %v1332_v38, %v1328_v7 }
0x20bf   :  { %v1336_v40 = vmul.f32 %v1333_v62, %v1278_v1 }
0x211c   :  { %v1339_v39 = vpop.permute.xlu0 %1338 }
0x211d   :  { %v1341_v8 = vmul.f32 %v1339_v39, %v1333_v62 }
0x211f   :  { %1343 = vrot.lane.b32.xlu1 %v1341_v8, %s2024_s4 }
0x2191   :  { %v1344_v41 = vpop.permute.xlu1 %1343 }
0x2192   :  { %v1346_v15 = vadd.f32 %v1344_v41, %v1336_v40  ;;  %v149_v40 = vadd.f32 %v2464_v50, %v2383_v3 }
0x2194   :  { %1988 = vtanh.f32 %v1346_v15 }
0x219a   :  { %v1989_v0 = vpop.eup %1988 }
0x219b   :  { %1349 = vrot.lane.b32.xlu2 %v1989_v0, %s2023_s12 }
0x21f5   :  { %v1350_v17 = vpop.permute.xlu2 %1349 }
0x21f6   :  { %v1352_v43 = vmul.f32 %v1350_v17, %v1333_v62 }
0x21f8   :  { %1354 = vrot.lane.b32.xlu0 %v1352_v43, %s2024_s4  ;;  %v1810_v43 = vmul.f32 -1.442695, %v2414_v61 }
0x226a   :  { %v1355_v44 = vpop.permute.xlu0 %1354 }
0x226b   :  { %1358 = vst.msk [vmem:[#allocation5 + $0x18] sm:$0xff] %vm53_vm0, %v1355_v44  ;;  %1824 = vmatmul.msk.f32.vlgmr.msrb.gmra.mxu3 %vm53_vm0, %v1355_v44 }
0x22ee   :  { %v1380_v46 = vpop.f32.mrf.mxu3 }
0x22ef   :  { %v1383_v47 = vadd.f32 %v1380_v46, %v155_v45 }
0x22f1   :  { %1990 = vtanh.f32 %v1383_v47  ;;  %v1825_v52 = vmul.f32 -1.442695, %v1383_v47 }
0x22f3   :  { %1992 = vpow2.f32 %v1825_v52 }
0x22f7   :  { %v1991_v48 = vpop.eup %1990 }
0x22f8   :  { %1406 = vrot.lane.b32.xlu1 %v1991_v48, %s2023_s12 }
0x22f9   :  { %v1993_v57 = vpop.eup %1992 }
0x22fa   :  { %v1387_v58 = vadd.f32 1.0, %v1993_v57 }
0x22fc   :  { %1994 = vrcp.f32 %v1387_v58  ;;  %v1399_v56 = vand.u32 2147483648, %v1387_v58  ;;  %vm1393_vm6 = vweird.f32 %v1387_v58  ;;  %v1397_v51 = vand.u32 2147483647, %v1387_v58 }
0x22fe   :  { %v1400_v4 = vor.u32 1.1754944e-38, %v1399_v56  ;;  %vm1398_vm8 = vcmp.eq.f32.partialorder %v1397_v51, 8.507059e+37 }
0x2302   :  { %v1995_v59 = vpop.eup %1994 }
0x2303   :  { %v1389_v60 = vmul.f32 %v1995_v59, %v1387_v58  ;;  %vm1394_vm5 = vweird.f32 %v1995_v59 }
0x2304   :  { %vm1395_vm7 = vmor %vm1393_vm6, %vm1394_vm5  ;;  %vm1757_vm6 = vcmask 64512  }
0x2305   :  { %v1390_v53 = vsub.f32 1.0, %v1389_v60 }
0x2307   :  { %v1391_v54 = vmul.f32 %v1995_v59, %v1390_v53 }
0x2309   :  { %v1392_v55 = vadd.f32 %v1995_v59, %v1391_v54 }
0x230b   :  { %v1396_v14 = vsel %vm1395_vm7, %v1995_v59, %v1392_v55 }
0x230c   :  { %v1401_v10 = vsel %vm1398_vm8, %v1400_v4, %v1396_v14 }
0x230d   :  { %v1404_v12 = vmul.f32 %v1401_v10, %v1346_v15 }
0x236a   :  { %v1407_v9 = vpop.permute.xlu1 %1406 }
0x236b   :  { %v1409_v11 = vmul.f32 %v1407_v9, %v1401_v10 }
0x236d   :  { %1411 = vrot.lane.b32.xlu2 %v1409_v11, %s2024_s4 }
0x23c7   :  { %v1412_v18 = vpop.permute.xlu2 %1411 }
0x23c8   :  { %v1414_v16 = vadd.f32 %v1412_v18, %v1404_v12 }
0x23ca   :  { %1996 = vtanh.f32 %v1414_v16 }
0x23d0   :  { %v1997_v13 = vpop.eup %1996 }
0x23d1   :  { %1417 = vrot.lane.b32.xlu0 %v1997_v13, %s2023_s12 }
0x2443   :  { %v1418_v20 = vpop.permute.xlu0 %1417 }
0x2444   :  { %v1420_v63 = vmul.f32 %v1418_v20, %v1401_v10 }
0x2446   :  { %1422 = vrot.lane.b32.xlu1 %v1420_v63, %s2024_s4 }
0x24b8   :  { %v1423_v22 = vpop.permute.xlu1 %1422 }
0x24b9   :  { %1426 = vst.msk [vmem:[#allocation5 + $0x10] sm:$0xff] %vm53_vm0, %v1423_v22  ;;  %1826 = vmatmul.msk.f32.vlgmr.msra.gmra.mxu2 %vm53_vm0, %v1423_v22 }
0x253c   :  { %v1448_v21 = vpop.f32.mrf.mxu2 }
0x253d   :  { %v1451_v1 = vadd.f32 %v1448_v21, %v152_v19 }
0x253f   :  { %1998 = vtanh.f32 %v1451_v1  ;;  %v1827_v24 = vmul.f32 -1.442695, %v1451_v1 }
0x2541   :  { %2000 = vpow2.f32 %v1827_v24 }
0x2545   :  { %v1999_v23 = vpop.eup %1998 }
0x2546   :  { %1474 = vrot.lane.b32.xlu2 %v1999_v23, %s2023_s12 }
0x2547   :  { %v2001_v2 = vpop.eup %2000 }
0x2548   :  { %v1455_v25 = vadd.f32 1.0, %v2001_v2 }
0x254a   :  { %2002 = vrcp.f32 %v1455_v25  ;;  %v1467_v31 = vand.u32 2147483648, %v1455_v25  ;;  %vm1461_vm10 = vweird.f32 %v1455_v25  ;;  %v1465_v49 = vand.u32 2147483647, %v1455_v25 }
0x254c   :  { %v1468_v33 = vor.u32 1.1754944e-38, %v1467_v31  ;;  %vm1466_vm12 = vcmp.eq.f32.partialorder %v1465_v49, 8.507059e+37 }
0x2550   :  { %v2003_v26 = vpop.eup %2002 }
0x2551   :  { %v1457_v27 = vmul.f32 %v2003_v26, %v1455_v25  ;;  %vm1462_vm9 = vweird.f32 %v2003_v26  ;;  %v1588_v25 = vld [vmem:[%s2591_s6 + $0x18] sm:$0xff] }
0x2552   :  { %vm1463_vm11 = vmor %vm1461_vm10, %vm1462_vm9  ;;  %1631 = vmatpush.msrb.mxu0 %v1588_v25 }
0x2553   :  { %v1458_v28 = vsub.f32 1.0, %v1457_v27  ;;  %v1585_v27 = vld [vmem:[%s2591_s6] sm:$0xff] }
0x2555   :  { %v1459_v29 = vmul.f32 %v2003_v26, %v1458_v28 }
0x2557   :  { %v1460_v30 = vadd.f32 %v2003_v26, %v1459_v29 }
0x2559   :  { %v1464_v32 = vsel %vm1463_vm11, %v2003_v26, %v1460_v30  ;;  %v1587_v26 = vld [vmem:[%s2591_s6 + $0x10] sm:$0xff] }
0x255a   :  { %v1469_v35 = vsel %vm1466_vm12, %v1468_v33, %v1464_v32  ;;  %1632 = vmatpush.msrb.mxu0 %v1587_v26 }
0x255b   :  { %v1472_v37 = vmul.f32 %v1469_v35, %v1414_v16 }
0x25a0   :  { %v1475_v34 = vpop.permute.xlu2 %1474 }
0x25a1   :  { %v1477_v36 = vmul.f32 %v1475_v34, %v1469_v35  ;;  %v1577_v34 = vld [vmem:[#allocation5 + $0x10] sm:$0xff] }
0x25a3   :  { %1479 = vrot.lane.b32.xlu0 %v1477_v36, %s2024_s4  ;;  %v1578_v36 = vld [vmem:[#allocation5 + $0x18] sm:$0xff] }
0x2615   :  { %v1480_v5 = vpop.permute.xlu0 %1479 }
0x2616   :  { %v2496_v6 = vadd.f32 %v1480_v5, %v1472_v37  ;;  %v1579_v37 = vld [vmem:[#allocation5 + $0x20] sm:$0xff] }
0x2618   :  { %2004 = vtanh.f32 %v2496_v6 }
0x2619   :  { %2006 = vtanh.f32 %v2414_v61 }
0x261e   :  { %v2005_v7 = vpop.eup %2004 }
0x261f   :  { %1485 = vrot.lane.b32.xlu1 %v2005_v7, %s2023_s12  ;;  %v2007_v62 = vpop.eup %2006  ;;  %v1581_v7 = vld [vmem:[#allocation5 + $0x30] sm:$0xff] }
0x2691   :  { %v1486_v38 = vpop.permute.xlu1 %1485 }
0x2692   :  { %v1488_v39 = vmul.f32 %v1486_v38, %v1469_v35  ;;  %v1582_v38 = vld [vmem:[#allocation5 + $0x38] sm:$0xff] }
0x2694   :  { %1490 = vrot.lane.b32.xlu2 %v1488_v39, %s2024_s4  ;;  %v1583_v39 = vld [vmem:[#allocation5 + $0x40] sm:$0xff] }
0x269c   :  { %864 = vrot.lane.b32.xlu2 %v2007_v62, %s2023_s12  ;;  %v1584_v62 = vld [vmem:[#allocation5 + $0x48] sm:$0xff] }
0x26ee   :  { %v1491_v8 = vpop.permute.xlu2 %1490 }
0x26ef   :  { %1494 = vst.msk [vmem:[#allocation5 + $0x8] sm:$0xff] %vm53_vm0, %v1491_v8  ;;  %1828 = vmatmul.msk.f32.vlgmr.msra.gmra.mxu3 %vm53_vm0, %v1491_v8  ;;  %v1861_v8 = vld [vmem:[%s2592_s7] ss:$0 sm:$0xff] }
0x26f6   :  { %v865_v16 = vpop.permute.xlu2 %864  ;;  %v1576_v33 = vld [vmem:[#allocation5 + $0x8] sm:$0xff] }
0x2772   :  { %v1515_v41 = vpop.f32.mrf.mxu3 }
0x2773   :  { %v1518_v15 = vadd.f32 %v1515_v41, %v149_v40  ;;  %v1713_v40 = vpop.f32.mrf.mxu1 }
0x2775   :  { %2008 = vtanh.f32 %v1518_v15  ;;  %v1829_v17 = vmul.f32 -1.442695, %v1518_v15 }
0x2777   :  { %2010 = vpow2.f32 %v1829_v17 }
0x2778   :  { %2012 = vpow2.f32 %v1810_v43 }
0x277b   :  { %v2009_v0 = vpop.eup %2008  ;;  %v1716_v17 = vpop.f32.mrf.mxu1 }
0x277c   :  { %1541 = vrot.lane.b32.xlu0 %v2009_v0, %s2023_s12 }
0x277d   :  { %v2011_v44 = vpop.eup %2010 }
0x277e   :  { %v1522_v45 = vadd.f32 1.0, %v2011_v44  ;;  %v2013_v46 = vpop.eup %2012 }
0x277f   :  { %v845_v47 = vadd.f32 1.0, %v2013_v46 }
0x2780   :  { %2014 = vrcp.f32 %v1522_v45  ;;  %v1534_v53 = vand.u32 2147483648, %v1522_v45  ;;  %vm1528_vm14 = vweird.f32 %v1522_v45  ;;  %v1532_v54 = vand.u32 2147483647, %v1522_v45 }
0x2781   :  { %2016 = vrcp.f32 %v845_v47  ;;  %v857_v10 = vand.u32 2147483648, %v845_v47  ;;  %vm851_vm3 = vweird.f32 %v845_v47  ;;  %v855_v11 = vand.u32 2147483647, %v845_v47 }
0x2782   :  { %v1535_v56 = vor.u32 1.1754944e-38, %v1534_v53  ;;  %vm1533_vm1 = vcmp.eq.f32.partialorder %v1532_v54, 8.507059e+37 }
0x2783   :  { %v858_v18 = vor.u32 1.1754944e-38, %v857_v10  ;;  %vm856_vm5 = vcmp.eq.f32.partialorder %v855_v11, 8.507059e+37  ;;  %v1719_v46 = vpop.f32.mrf.mxu1 }
0x2786   :  { %v2015_v48 = vpop.eup %2014 }
0x2787   :  { %v1524_v52 = vmul.f32 %v2015_v48, %v1522_v45  ;;  %v2017_v50 = vpop.eup %2016  ;;  %vm1529_vm13 = vweird.f32 %v2015_v48 }
0x2788   :  { %v847_v57 = vmul.f32 %v2017_v50, %v845_v47  ;;  %vm1530_vm15 = vmor %vm1528_vm14, %vm1529_vm13  ;;  %vm852_vm2 = vweird.f32 %v2017_v50 }
0x2789   :  { %v1525_v3 = vsub.f32 1.0, %v1524_v52  ;;  %vm853_vm4 = vmor %vm851_vm3, %vm852_vm2 }
0x278a   :  { %v848_v59 = vsub.f32 1.0, %v847_v57 }
0x278b   :  { %v1526_v58 = vmul.f32 %v2015_v48, %v1525_v3  ;;  %v1722_v3 = vpop.f32.mrf.mxu1 }
0x278c   :  { %v849_v61 = vmul.f32 %v2017_v50, %v848_v59 }
0x278d   :  { %v1527_v60 = vadd.f32 %v2015_v48, %v1526_v58 }
0x278e   :  { %v850_v4 = vadd.f32 %v2017_v50, %v849_v61 }
0x278f   :  { %v1531_v55 = vsel %vm1530_vm15, %v2015_v48, %v1527_v60 }
0x2790   :  { %v1536_v14 = vsel %vm1533_vm1, %v1535_v56, %v1531_v55  ;;  %v854_v12 = vsel %vm853_vm4, %v2017_v50, %v850_v4 }
0x2791   :  { %v859_v13 = vsel %vm856_vm5, %v858_v18, %v854_v12  ;;  %v1539_v63 = vmul.f32 %v1536_v14, %v2496_v6  ;;  %v1580_v6 = vld [vmem:[#allocation5 + $0x28] sm:$0xff] }
0x2792   :  { %v867_v20 = vmul.f32 %v865_v16, %v859_v13  ;;  %v862_v21 = vmul.f32 %v859_v13, %v2392_v42  ;;  %v1586_v42 = vld [vmem:[%s2591_s6 + $0x8] sm:$0xff] }
0x2793   :  { %1633 = vmatpush.msrb.mxu0 %v1586_v42  ;;  %v1725_v59 = vpop.f32.mrf.mxu1 }
0x2795   :  { %1634 = vmatpush.msrb.mxu0 %v1585_v27 }
0x279b   :  { %v1728_v61 = vpop.f32.mrf.mxu1 }
0x27ee   :  { %v1542_v51 = vpop.permute.xlu0 %1541 }
0x27ef   :  { %v1544_v9 = vmul.f32 %v1542_v51, %v1536_v14 }
0x27f1   :  { %1546 = vrot.lane.b32.xlu1 %v1544_v9, %s2024_s4 }
0x27f9   :  { %869 = vrot.lane.b32.xlu1 %v867_v20, %s2024_s4 }
0x2863   :  { %v1547_v22 = vpop.permute.xlu1 %1546 }
0x2864   :  { %v1549_v19 = vadd.f32 %v1547_v22, %v1539_v63 }
0x2866   :  { %2018 = vtanh.f32 %v1549_v19 }
0x286b   :  { %v870_v1 = vpop.permute.xlu1 %869 }
0x286c   :  { %v2019_v23 = vpop.eup %2018  ;;  %v872_v24 = vadd.f32 %v870_v1, %v862_v21 }
0x286d   :  { %1552 = vrot.lane.b32.xlu0 %v2019_v23, %s2023_s12 }
0x286e   :  { %2020 = vtanh.f32 %v872_v24 }
0x2874   :  { %v2021_v2 = vpop.eup %2020 }
0x2875   :  { %875 = vrot.lane.b32.xlu0 %v2021_v2, %s2023_s12 }
0x28df   :  { %v1553_v28 = vpop.permute.xlu0 %1552 }
0x28e0   :  { %v1555_v29 = vmul.f32 %v1553_v28, %v1536_v14  ;;  %v1731_v14 = vpop.f32.mrf.mxu1 }
0x28e2   :  { %1557 = vrot.lane.b32.xlu2 %v1555_v29, %s2024_s4 }
0x28e7   :  { %v876_v30 = vpop.permute.xlu0 %875 }
0x28e8   :  { %v878_v31 = vmul.f32 %v876_v30, %v859_v13  ;;  %v1734_v11 = vpop.f32.mrf.mxu1 }
0x28ea   :  { %880 = vrot.lane.b32.xlu1 %v878_v31, %s2024_s4 }
0x28f0   :  { %v1737_v13 = vpop.f32.mrf.mxu1 }
0x293c   :  { %v1558_v49 = vpop.permute.xlu2 %1557 }
0x293d   :  { %1560 = vst.msk [vmem:[#allocation5] sm:$0xff] %vm53_vm0, %v1558_v49 }
0x2944   :  { %v1575_v32 = vld [vmem:[#allocation5] sm:$0xff] }
0x2945   :  { %1830 = vmatmul.msk.f32.vlgmr.msrb.gmra.mxu0 %vm53_vm0, %v1575_v32 }
0x294d   :  { %1831 = vmatmul.msk.f32.gmra.mxu0 %vm53_vm0, %v1576_v33 }
0x2955   :  { %1832 = vmatmul.msk.f32.gmra.mxu0 %vm53_vm0, %v1577_v34 }
0x295c   :  { %v881_v35 = vpop.permute.xlu1 %880 }
0x295d   :  { %884 = vst.msk [vmem:[#allocation4 + $0x48] sm:$0xff] %vm53_vm0, %v881_v35  ;;  %1833 = vmatmul.msk.f32.gmra.mxu0 %vm53_vm0, %v1578_v36 }
0x2964   :  { %v1570_v5 = vld [vmem:[#allocation4 + $0x48] sm:$0xff] }
0x2965   :  { %1834 = vmatmul.msk.f32.gmra.mxu0 %vm53_vm0, %v1579_v37  ;;  %1849 = vmatmul.msk.f32.gmra.mxu1 %vm53_vm0, %v1570_v5 }
0x296d   :  { %1835 = vmatmul.msk.f32.gmra.mxu0 %vm53_vm0, %v1580_v6 }
0x2975   :  { %1836 = vmatmul.msk.f32.gmra.mxu0 %vm53_vm0, %v1581_v7 }
0x297d   :  { %1837 = vmatmul.msk.f32.gmra.mxu0 %vm53_vm0, %v1582_v38 }
0x2985   :  { %1838 = vmatmul.msk.f32.gmra.mxu0 %vm53_vm0, %v1583_v39 }
0x298d   :  { %1839 = vmatmul.msk.f32.gmra.mxu0 %vm53_vm0, %v1584_v62 }
0x29c2   :  { %v1636_v41 = vpop.f32.mrf.mxu0 }
0x29c3   :  { %v1714_v15 = vadd.f32 %v1713_v40, %v1636_v41 }
0x29c5   :  { %v1747_v0 = vadd.f32 %v1861_v8, %v1714_v15 }
0x29c7   :  { %1758 = vst.msk [vmem:[%s2593_s8] sm:$0xff] %vm1757_vm6, %v1747_v0 }
0x29ca   :  { %v1639_v43 = vpop.f32.mrf.mxu0 }
0x29cb   :  { %v1717_v44 = vadd.f32 %v1716_v17, %v1639_v43 }
0x29cd   :  { %v1748_v45 = vadd.f32 %v1861_v8, %v1717_v44 }
0x29cf   :  { %1759 = vst.msk [vmem:[%s2593_s8 + $0x8] sm:$0xff] %vm1757_vm6, %v1748_v45 }
0x29d2   :  { %v1642_v47 = vpop.f32.mrf.mxu0 }
0x29d3   :  { %v1720_v48 = vadd.f32 %v1719_v46, %v1642_v47 }
0x29d5   :  { %v1749_v52 = vadd.f32 %v1861_v8, %v1720_v48 }
0x29d7   :  { %1760 = vst.msk [vmem:[%s2593_s8 + $0x10] sm:$0xff] %vm1757_vm6, %v1749_v52 }
0x29da   :  { %v1645_v50 = vpop.f32.mrf.mxu0 }
0x29db   :  { %v1723_v57 = vadd.f32 %v1722_v3, %v1645_v50 }
0x29dd   :  { %v1750_v58 = vadd.f32 %v1861_v8, %v1723_v57 }
0x29df   :  { %1761 = vst.msk [vmem:[%s2593_s8 + $0x18] sm:$0xff] %vm1757_vm6, %v1750_v58 }
0x29e2   :  { %v1648_v60 = vpop.f32.mrf.mxu0  ;;  %v1740_v19 = vpop.f32.mrf.mxu1 }
0x29e3   :  { %v1726_v53 = vadd.f32 %v1725_v59, %v1648_v60 }
0x29e5   :  { %v1751_v54 = vadd.f32 %v1861_v8, %v1726_v53 }
0x29e7   :  { %1762 = vst.msk [vmem:[%s2593_s8 + $0x20] sm:$0xff] %vm1757_vm6, %v1751_v54 }
0x29ea   :  { %v1651_v55 = vpop.f32.mrf.mxu0 }
0x29eb   :  { %v1729_v56 = vadd.f32 %v1728_v61, %v1651_v55 }
0x29ed   :  { %v1752_v51 = vadd.f32 %v1861_v8, %v1729_v56 }
0x29ef   :  { %1763 = vst.msk [vmem:[%s2593_s8 + $0x28] sm:$0xff] %vm1757_vm6, %v1752_v51 }
0x29f2   :  { %v1654_v4 = vpop.f32.mrf.mxu0 }
0x29f3   :  { %v1732_v9 = vadd.f32 %v1731_v14, %v1654_v4 }
0x29f5   :  { %v1753_v10 = vadd.f32 %v1861_v8, %v1732_v9 }
0x29f7   :  { %1764 = vst.msk [vmem:[%s2593_s8 + $0x30] sm:$0xff] %vm1757_vm6, %v1753_v10 }
0x29fa   :  { %v1657_v12 = vpop.f32.mrf.mxu0 }
0x29fb   :  { %v1735_v18 = vadd.f32 %v1734_v11, %v1657_v12 }
0x29fd   :  { %v1754_v16 = vadd.f32 %v1861_v8, %v1735_v18 }
0x29ff   :  { %1765 = vst.msk [vmem:[%s2593_s8 + $0x38] sm:$0xff] %vm1757_vm6, %v1754_v16 }
0x2a02   :  { %v1660_v20 = vpop.f32.mrf.mxu0 }
0x2a03   :  { %v1738_v63 = vadd.f32 %v1737_v13, %v1660_v20 }
0x2a05   :  { %v1755_v22 = vadd.f32 %v1861_v8, %v1738_v63 }
0x2a07   :  { %1766 = vst.msk [vmem:[%s2593_s8 + $0x40] sm:$0xff] %vm1757_vm6, %v1755_v22 }
0x2a0a   :  { %v1663_v21 = vpop.f32.mrf.mxu0 }
0x2a0b   :  { %v1741_v1 = vadd.f32 %v1740_v19, %v1663_v21 }
0x2a0d   :  { %v1756_v23 = vadd.f32 %v1861_v8, %v1741_v1 }
0x2a0f   :  { %1767 = vst.msk [vmem:[%s2593_s8 + $0x48] sm:$0xff] %vm1757_vm6, %v1756_v23 }

</bundles_post_ra>
